<compile_context>
chip_gen: v5e
topology: v5e:2x2
jax: 0.10.0
libtpu: 0.0.40
codegen_flags: <defaults>
</compile_context>

<pallas_src>
import numpy as np
import jax
import jax.numpy as jnp
from jax.experimental import pallas as pl
from jax.experimental.pallas import tpu as pltpu

C_OUT = 6          # conv output channels
KSZ = 5            # conv kernel size
H_IN = 32          # input spatial size
H_CONV = 28        # conv output spatial size
H_POOL = 14        # pooled spatial size
NC = C_OUT * H_CONV    # 168: all channels side-by-side along lanes (conv)
NP = C_OUT * H_POOL    # 84:  all channels side-by-side along lanes (pooled)
PAD = 128          # MXU-friendly hidden width (120 -> 128, 84 -> 128, 10 -> 128)


# ----------------------------------------------------------------------------
# Fused kernel: one batch item per grid step.
# ----------------------------------------------------------------------------
def simple_nn_kernel(x_ref, wc_ref, bc_ref, rsel_ref, csel_ref,
                     w1_ref, b1_ref, w2_ref, b2_ref, w3_ref, b3_ref, o_ref):
    x = x_ref[0, 0, :, :]                                    # (32, 32)

    # conv1: 5 banded MXU matmuls, all 6 output channels at once -> (28, 168)
    acc = jnp.dot(x[0:H_CONV, :], wc_ref[0], preferred_element_type=jnp.float32)
    for ki in range(1, KSZ):
        acc = acc + jnp.dot(x[ki:ki + H_CONV, :], wc_ref[ki],
                            preferred_element_type=jnp.float32)
    acc = jnp.maximum(acc + bc_ref[...], 0.0)                # bias + ReLU

    # 2x2 max-pool: row pairs then column pairs, batched over channels.
    rmax = jnp.maximum(
        jnp.dot(rsel_ref[0], acc, preferred_element_type=jnp.float32),
        jnp.dot(rsel_ref[1], acc, preferred_element_type=jnp.float32))   # (14, 168)
    pooled = jnp.maximum(
        jnp.dot(rmax, csel_ref[0], preferred_element_type=jnp.float32),
        jnp.dot(rmax, csel_ref[1], preferred_element_type=jnp.float32))  # (14, 84)

    # fc1: weights pre-permuted to the pooled [row, ch*14+col] layout and
    # padded to 128 output lanes; contract row by row and accumulate.
    h = b1_ref[...]                                          # (1, 128)
    for r in range(H_POOL):
        h = h + jnp.dot(pooled[r:r + 1, :], w1_ref[r],
                        preferred_element_type=jnp.float32)
    h = jnp.maximum(h, 0.0)

    # fc2 -> ReLU -> fc3 on 128-wide padded tiles; lane-dense (1,128) store.
    h = jnp.maximum(
        jnp.dot(h, w2_ref[...], preferred_element_type=jnp.float32) + b2_ref[...],
        0.0)
    o_ref[0] = (jnp.dot(h, w3_ref[...], preferred_element_type=jnp.float32)
                + b3_ref[...])


# ----------------------------------------------------------------------------
# One-time host-side parameter preparation (done once, not per forward call).
# ----------------------------------------------------------------------------
def prepare_params(params):
    conv_w, conv_b, w1, b1, w2, b2, w3, b3 = [np.asarray(p, np.float32) for p in params]

    # Banded conv weights: acc[r, co*28+c] = sum_ki (x[r+ki, :] @ wc[ki])[co*28+c]
    wc = np.zeros((KSZ, H_IN, NC), np.float32)
    for ki in range(KSZ):
        for co in range(C_OUT):
            for c in range(H_CONV):
                for kj in range(KSZ):
                    wc[ki, c + kj, co * H_CONV + c] = conv_w[co, 0, ki, kj]

    # Conv bias broadcast row: (1, 168)
    bc = np.zeros((1, NC), np.float32)
    for co in range(C_OUT):
        bc[0, co * H_CONV:(co + 1) * H_CONV] = conv_b[co]

    # Row-pair selectors (even/odd conv rows): (2, 14, 28)
    rsel = np.zeros((2, H_POOL, H_CONV), np.float32)
    for r in range(H_POOL):
        rsel[0, r, 2 * r] = 1.0
        rsel[1, r, 2 * r + 1] = 1.0

    # Column-pair selectors within each channel's 28-column block: (2, 168, 84)
    csel = np.zeros((2, NC, NP), np.float32)
    for co in range(C_OUT):
        for c in range(H_POOL):
            csel[0, co * H_CONV + 2 * c, co * H_POOL + c] = 1.0
            csel[1, co * H_CONV + 2 * c + 1, co * H_POOL + c] = 1.0

    # fc1: permute (out, co*196 + r*14 + c) -> (r, co*14 + c, out), pad out->128
    w1_4d = w1.reshape(120, C_OUT, H_POOL, H_POOL)          # [o, co, r, c]
    w1_perm = np.transpose(w1_4d, (2, 1, 3, 0)).reshape(H_POOL, NP, 120)
    w1r = np.zeros((H_POOL, NP, PAD), np.float32)
    w1r[:, :, :120] = w1_perm
    b1p = np.zeros((1, PAD), np.float32); b1p[0, :120] = b1

    # fc2 / fc3: pre-transpose to (in, out) and zero-pad to 128x128 tiles.
    w2p = np.zeros((PAD, PAD), np.float32); w2p[:120, :84] = w2.T
    b2p = np.zeros((1, PAD), np.float32);   b2p[0, :84] = b2
    w3p = np.zeros((PAD, PAD), np.float32); w3p[:84, :10] = w3.T
    b3p = np.zeros((1, PAD), np.float32);   b3p[0, :10] = b3

    return tuple(jnp.asarray(a) for a in
                 (wc, bc, rsel, csel, w1r, b1p, w2p, b2p, w3p, b3p))


# ----------------------------------------------------------------------------
# Forward wrapper: one fused pallas_call, batch-parallel grid.
# ----------------------------------------------------------------------------
def simple_nn_forward(x, prepared):
    B = x.shape[0]
    out = pl.pallas_call(
        simple_nn_kernel,
        out_shape=jax.ShapeDtypeStruct((B, 1, PAD), jnp.float32),
        grid=(B,),
        in_specs=[
            pl.BlockSpec((1, 1, H_IN, H_IN), lambda b: (b, 0, 0, 0)),   # x
            pl.BlockSpec((KSZ, H_IN, NC),    lambda b: (0, 0, 0)),      # wc
            pl.BlockSpec((1, NC),            lambda b: (0, 0)),         # bc
            pl.BlockSpec((2, H_POOL, H_CONV), lambda b: (0, 0, 0)),     # rsel
            pl.BlockSpec((2, NC, NP),        lambda b: (0, 0, 0)),      # csel
            pl.BlockSpec((H_POOL, NP, PAD),  lambda b: (0, 0, 0)),      # w1r
            pl.BlockSpec((1, PAD),           lambda b: (0, 0)),         # b1p
            pl.BlockSpec((PAD, PAD),         lambda b: (0, 0)),         # w2p
            pl.BlockSpec((1, PAD),           lambda b: (0, 0)),         # b2p
            pl.BlockSpec((PAD, PAD),         lambda b: (0, 0)),         # w3p
            pl.BlockSpec((1, PAD),           lambda b: (0, 0)),         # b3p
        ],
        out_specs=pl.BlockSpec((1, 1, PAD), lambda b: (b, 0, 0)),
        compiler_params=pltpu.CompilerParams(dimension_semantics=("parallel",)),
    )(x, *prepared)
    return out[:, 0, :10]


# ----------------------------------------------------------------------------
# Pure-numpy reference of the PyTorch forward (cross-correlation conv).
# ----------------------------------------------------------------------------
def reference_forward(x, params):
    conv_w, conv_b, w1, b1, w2, b2, w3, b3 = [np.asarray(p, np.float32) for p in params]
    x = np.asarray(x, np.float32)
    B = x.shape[0]
    conv = np.zeros((B, 6, 28, 28), np.float32)
    for b in range(B):
        for co in range(6):
            acc = np.full((28, 28), conv_b[co], np.float32)
            for ki in range(5):
                for kj in range(5):
                    acc += x[b, 0, ki:ki + 28, kj:kj + 28] * conv_w[co, 0, ki, kj]
            conv[b, co] = acc
    conv = np.maximum(conv, 0.0)
    pooled = conv.reshape(B, 6, 14, 2, 14, 2).max(axis=(3, 5))
    feats = pooled.reshape(B, -1)
    h = np.maximum(feats @ w1.T + b1, 0.0)
    h = np.maximum(h @ w2.T + b2, 0.0)
    return h @ w3.T + b3


if __name__ == "__main__":
    key = jax.random.PRNGKey(0)
    ks = jax.random.split(key, 9)

    # Deterministic synthetic parameters (PyTorch-shaped).
    conv_w = jax.random.normal(ks[0], (6, 1, 5, 5), jnp.float32) * 0.1
    conv_b = jax.random.normal(ks[1], (6,), jnp.float32) * 0.1
    w1 = jax.random.normal(ks[2], (120, 6 * 14 * 14), jnp.float32) * 0.03
    b1 = jax.random.normal(ks[3], (120,), jnp.float32) * 0.03
    w2 = jax.random.normal(ks[4], (84, 120), jnp.float32) * 0.05
    b2 = jax.random.normal(ks[5], (84,), jnp.float32) * 0.05
    w3 = jax.random.normal(ks[6], (10, 84), jnp.float32) * 0.05
    b3 = jax.random.normal(ks[7], (10,), jnp.float32) * 0.05
    params = (conv_w, conv_b, w1, b1, w2, b2, w3, b3)

    x = jax.random.normal(ks[8], (2, 1, 32, 32), jnp.float32)

    prepared = prepare_params(params)   # one-time weight prep (no per-call .T)
    out = simple_nn_forward(x, prepared)
    out = jax.block_until_ready(out)

    ref = reference_forward(x, params)
    np.testing.assert_allclose(np.asarray(out), ref, rtol=2e-2, atol=2e-2)

    print("KERNEL_OK")
</pallas_src>

<mosaic_0001>
module attributes {stable_mosaic.version = 11 : i64} {
  func.func @simple_nn_kernel(%arg0: i32, %arg1: memref<1x1x32x32xf32, #tpu.memory_space<vmem>>, %arg2: memref<5x32x168xf32, #tpu.memory_space<vmem>>, %arg3: memref<1x168xf32, #tpu.memory_space<vmem>>, %arg4: memref<2x14x28xf32, #tpu.memory_space<vmem>>, %arg5: memref<2x168x84xf32, #tpu.memory_space<vmem>>, %arg6: memref<14x84x128xf32, #tpu.memory_space<vmem>>, %arg7: memref<1x128xf32, #tpu.memory_space<vmem>>, %arg8: memref<128x128xf32, #tpu.memory_space<vmem>>, %arg9: memref<1x128xf32, #tpu.memory_space<vmem>>, %arg10: memref<128x128xf32, #tpu.memory_space<vmem>>, %arg11: memref<1x128xf32, #tpu.memory_space<vmem>>, %arg12: memref<1x1x128xf32, #tpu.memory_space<vmem>>) attributes {dimension_semantics = [#tpu.dimension_semantics<parallel>], iteration_bounds = array<i64: 2>, scalar_prefetch = 0 : i64, scratch_operands = 0 : i64, tpu.core_type = #tpu.core_type<tc>, window_params = [{transform_indices = @transform_0, window_bounds = array<i64: 1, 1, 32, 32>}, {pipeline_mode = #tpu.pipeline_mode<synchronous>, transform_indices = @transform_1, window_bounds = array<i64: 5, 32, 168>}, {pipeline_mode = #tpu.pipeline_mode<synchronous>, transform_indices = @transform_2, window_bounds = array<i64: 1, 168>}, {pipeline_mode = #tpu.pipeline_mode<synchronous>, transform_indices = @transform_3, window_bounds = array<i64: 2, 14, 28>}, {pipeline_mode = #tpu.pipeline_mode<synchronous>, transform_indices = @transform_4, window_bounds = array<i64: 2, 168, 84>}, {pipeline_mode = #tpu.pipeline_mode<synchronous>, transform_indices = @transform_5, window_bounds = array<i64: 14, 84, 128>}, {pipeline_mode = #tpu.pipeline_mode<synchronous>, transform_indices = @transform_6, window_bounds = array<i64: 1, 128>}, {pipeline_mode = #tpu.pipeline_mode<synchronous>, transform_indices = @transform_7, window_bounds = array<i64: 128, 128>}, {pipeline_mode = #tpu.pipeline_mode<synchronous>, transform_indices = @transform_8, window_bounds = array<i64: 1, 128>}, {pipeline_mode = #tpu.pipeline_mode<synchronous>, transform_indices = @transform_9, window_bounds = array<i64: 128, 128>}, {pipeline_mode = #tpu.pipeline_mode<synchronous>, transform_indices = @transform_10, window_bounds = array<i64: 1, 128>}, {transform_indices = @transform_11, window_bounds = array<i64: 1, 1, 128>}]} {
    %c0 = arith.constant 0 : index
    %c0_0 = arith.constant 0 : index
    %c0_1 = arith.constant 0 : index
    %c0_2 = arith.constant 0 : index
    %0 = vector.load %arg1[%c0, %c0_0, %c0_1, %c0_2] : memref<1x1x32x32xf32, #tpu.memory_space<vmem>>, vector<1x1x32x32xf32>
    %1 = vector.shape_cast %0 : vector<1x1x32x32xf32> to vector<32x32xf32>
    %2 = vector.extract_strided_slice %1 {offsets = [0, 0], sizes = [28, 32], strides = [1, 1]} : vector<32x32xf32> to vector<28x32xf32>
    %c0_3 = arith.constant 0 : index
    %c0_4 = arith.constant 0 : index
    %c0_5 = arith.constant 0 : index
    %3 = vector.load %arg2[%c0_3, %c0_4, %c0_5] : memref<5x32x168xf32, #tpu.memory_space<vmem>>, vector<1x32x168xf32>
    %4 = vector.shape_cast %3 : vector<1x32x168xf32> to vector<32x168xf32>
    %cst = arith.constant dense<0.000000e+00> : vector<28x168xf32>
    %5 = tpu.matmul %2, %4, %cst {dimension_numbers = #tpu.dot_dimension_numbers<[1], [0], [0], [1], [0, 0, 1, 1], [], []>} : vector<28x32xf32>, vector<32x168xf32>, vector<28x168xf32> -> vector<28x168xf32>
    %6 = vector.extract_strided_slice %1 {offsets = [1, 0], sizes = [28, 32], strides = [1, 1]} : vector<32x32xf32> to vector<28x32xf32>
    %c1 = arith.constant 1 : index
    %c0_6 = arith.constant 0 : index
    %c0_7 = arith.constant 0 : index
    %7 = vector.load %arg2[%c1, %c0_6, %c0_7] : memref<5x32x168xf32, #tpu.memory_space<vmem>>, vector<1x32x168xf32>
    %8 = vector.shape_cast %7 : vector<1x32x168xf32> to vector<32x168xf32>
    %cst_8 = arith.constant dense<0.000000e+00> : vector<28x168xf32>
    %9 = tpu.matmul %6, %8, %cst_8 {dimension_numbers = #tpu.dot_dimension_numbers<[1], [0], [0], [1], [0, 0, 1, 1], [], []>} : vector<28x32xf32>, vector<32x168xf32>, vector<28x168xf32> -> vector<28x168xf32>
    %10 = arith.addf %5, %9 : vector<28x168xf32>
    %11 = vector.extract_strided_slice %1 {offsets = [2, 0], sizes = [28, 32], strides = [1, 1]} : vector<32x32xf32> to vector<28x32xf32>
    %c2 = arith.constant 2 : index
    %c0_9 = arith.constant 0 : index
    %c0_10 = arith.constant 0 : index
    %12 = vector.load %arg2[%c2, %c0_9, %c0_10] : memref<5x32x168xf32, #tpu.memory_space<vmem>>, vector<1x32x168xf32>
    %13 = vector.shape_cast %12 : vector<1x32x168xf32> to vector<32x168xf32>
    %cst_11 = arith.constant dense<0.000000e+00> : vector<28x168xf32>
    %14 = tpu.matmul %11, %13, %cst_11 {dimension_numbers = #tpu.dot_dimension_numbers<[1], [0], [0], [1], [0, 0, 1, 1], [], []>} : vector<28x32xf32>, vector<32x168xf32>, vector<28x168xf32> -> vector<28x168xf32>
    %15 = arith.addf %10, %14 : vector<28x168xf32>
    %16 = vector.extract_strided_slice %1 {offsets = [3, 0], sizes = [28, 32], strides = [1, 1]} : vector<32x32xf32> to vector<28x32xf32>
    %c3 = arith.constant 3 : index
    %c0_12 = arith.constant 0 : index
    %c0_13 = arith.constant 0 : index
    %17 = vector.load %arg2[%c3, %c0_12, %c0_13] : memref<5x32x168xf32, #tpu.memory_space<vmem>>, vector<1x32x168xf32>
    %18 = vector.shape_cast %17 : vector<1x32x168xf32> to vector<32x168xf32>
    %cst_14 = arith.constant dense<0.000000e+00> : vector<28x168xf32>
    %19 = tpu.matmul %16, %18, %cst_14 {dimension_numbers = #tpu.dot_dimension_numbers<[1], [0], [0], [1], [0, 0, 1, 1], [], []>} : vector<28x32xf32>, vector<32x168xf32>, vector<28x168xf32> -> vector<28x168xf32>
    %20 = arith.addf %15, %19 : vector<28x168xf32>
    %21 = vector.extract_strided_slice %1 {offsets = [4, 0], sizes = [28, 32], strides = [1, 1]} : vector<32x32xf32> to vector<28x32xf32>
    %c4 = arith.constant 4 : index
    %c0_15 = arith.constant 0 : index
    %c0_16 = arith.constant 0 : index
    %22 = vector.load %arg2[%c4, %c0_15, %c0_16] : memref<5x32x168xf32, #tpu.memory_space<vmem>>, vector<1x32x168xf32>
    %23 = vector.shape_cast %22 : vector<1x32x168xf32> to vector<32x168xf32>
    %cst_17 = arith.constant dense<0.000000e+00> : vector<28x168xf32>
    %24 = tpu.matmul %21, %23, %cst_17 {dimension_numbers = #tpu.dot_dimension_numbers<[1], [0], [0], [1], [0, 0, 1, 1], [], []>} : vector<28x32xf32>, vector<32x168xf32>, vector<28x168xf32> -> vector<28x168xf32>
    %25 = arith.addf %20, %24 : vector<28x168xf32>
    %c0_18 = arith.constant 0 : index
    %c0_19 = arith.constant 0 : index
    %26 = vector.load %arg3[%c0_18, %c0_19] : memref<1x168xf32, #tpu.memory_space<vmem>>, vector<1x168xf32>
    %27 = vector.broadcast %26 : vector<1x168xf32> to vector<28x168xf32>
    %28 = arith.addf %25, %27 : vector<28x168xf32>
    %cst_20 = arith.constant 0.000000e+00 : f32
    %29 = vector.broadcast %cst_20 : f32 to vector<28x168xf32>
    %30 = arith.maximumf %28, %29 : vector<28x168xf32>
    %c0_21 = arith.constant 0 : index
    %c0_22 = arith.constant 0 : index
    %c0_23 = arith.constant 0 : index
    %31 = vector.load %arg4[%c0_21, %c0_22, %c0_23] : memref<2x14x28xf32, #tpu.memory_space<vmem>>, vector<1x14x28xf32>
    %32 = vector.shape_cast %31 : vector<1x14x28xf32> to vector<14x28xf32>
    %cst_24 = arith.constant dense<0.000000e+00> : vector<14x168xf32>
    %33 = tpu.matmul %32, %30, %cst_24 {dimension_numbers = #tpu.dot_dimension_numbers<[1], [0], [0], [1], [0, 0, 1, 1], [], []>} : vector<14x28xf32>, vector<28x168xf32>, vector<14x168xf32> -> vector<14x168xf32>
    %c1_25 = arith.constant 1 : index
    %c0_26 = arith.constant 0 : index
    %c0_27 = arith.constant 0 : index
    %34 = vector.load %arg4[%c1_25, %c0_26, %c0_27] : memref<2x14x28xf32, #tpu.memory_space<vmem>>, vector<1x14x28xf32>
    %35 = vector.shape_cast %34 : vector<1x14x28xf32> to vector<14x28xf32>
    %cst_28 = arith.constant dense<0.000000e+00> : vector<14x168xf32>
    %36 = tpu.matmul %35, %30, %cst_28 {dimension_numbers = #tpu.dot_dimension_numbers<[1], [0], [0], [1], [0, 0, 1, 1], [], []>} : vector<14x28xf32>, vector<28x168xf32>, vector<14x168xf32> -> vector<14x168xf32>
    %37 = arith.maximumf %33, %36 : vector<14x168xf32>
    %c0_29 = arith.constant 0 : index
    %c0_30 = arith.constant 0 : index
    %c0_31 = arith.constant 0 : index
    %38 = vector.load %arg5[%c0_29, %c0_30, %c0_31] : memref<2x168x84xf32, #tpu.memory_space<vmem>>, vector<1x168x84xf32>
    %39 = vector.shape_cast %38 : vector<1x168x84xf32> to vector<168x84xf32>
    %cst_32 = arith.constant dense<0.000000e+00> : vector<14x84xf32>
    %40 = tpu.matmul %37, %39, %cst_32 {dimension_numbers = #tpu.dot_dimension_numbers<[1], [0], [0], [1], [0, 0, 1, 1], [], []>} : vector<14x168xf32>, vector<168x84xf32>, vector<14x84xf32> -> vector<14x84xf32>
    %c1_33 = arith.constant 1 : index
    %c0_34 = arith.constant 0 : index
    %c0_35 = arith.constant 0 : index
    %41 = vector.load %arg5[%c1_33, %c0_34, %c0_35] : memref<2x168x84xf32, #tpu.memory_space<vmem>>, vector<1x168x84xf32>
    %42 = vector.shape_cast %41 : vector<1x168x84xf32> to vector<168x84xf32>
    %cst_36 = arith.constant dense<0.000000e+00> : vector<14x84xf32>
    %43 = tpu.matmul %37, %42, %cst_36 {dimension_numbers = #tpu.dot_dimension_numbers<[1], [0], [0], [1], [0, 0, 1, 1], [], []>} : vector<14x168xf32>, vector<168x84xf32>, vector<14x84xf32> -> vector<14x84xf32>
    %44 = arith.maximumf %40, %43 : vector<14x84xf32>
    %c0_37 = arith.constant 0 : index
    %c0_38 = arith.constant 0 : index
    %45 = vector.load %arg7[%c0_37, %c0_38] : memref<1x128xf32, #tpu.memory_space<vmem>>, vector<1x128xf32>
    %46 = vector.extract_strided_slice %44 {offsets = [0, 0], sizes = [1, 84], strides = [1, 1]} : vector<14x84xf32> to vector<1x84xf32>
    %c0_39 = arith.constant 0 : index
    %c0_40 = arith.constant 0 : index
    %c0_41 = arith.constant 0 : index
    %47 = vector.load %arg6[%c0_39, %c0_40, %c0_41] : memref<14x84x128xf32, #tpu.memory_space<vmem>>, vector<1x84x128xf32>
    %48 = vector.shape_cast %47 : vector<1x84x128xf32> to vector<84x128xf32>
    %cst_42 = arith.constant dense<0.000000e+00> : vector<1x128xf32>
    %49 = tpu.matmul %46, %48, %cst_42 {dimension_numbers = #tpu.dot_dimension_numbers<[1], [0], [0], [1], [0, 0, 1, 1], [], []>} : vector<1x84xf32>, vector<84x128xf32>, vector<1x128xf32> -> vector<1x128xf32>
    %50 = arith.addf %45, %49 : vector<1x128xf32>
    %51 = vector.extract_strided_slice %44 {offsets = [1, 0], sizes = [1, 84], strides = [1, 1]} : vector<14x84xf32> to vector<1x84xf32>
    %c1_43 = arith.constant 1 : index
    %c0_44 = arith.constant 0 : index
    %c0_45 = arith.constant 0 : index
    %52 = vector.load %arg6[%c1_43, %c0_44, %c0_45] : memref<14x84x128xf32, #tpu.memory_space<vmem>>, vector<1x84x128xf32>
    %53 = vector.shape_cast %52 : vector<1x84x128xf32> to vector<84x128xf32>
    %cst_46 = arith.constant dense<0.000000e+00> : vector<1x128xf32>
    %54 = tpu.matmul %51, %53, %cst_46 {dimension_numbers = #tpu.dot_dimension_numbers<[1], [0], [0], [1], [0, 0, 1, 1], [], []>} : vector<1x84xf32>, vector<84x128xf32>, vector<1x128xf32> -> vector<1x128xf32>
    %55 = arith.addf %50, %54 : vector<1x128xf32>
    %56 = vector.extract_strided_slice %44 {offsets = [2, 0], sizes = [1, 84], strides = [1, 1]} : vector<14x84xf32> to vector<1x84xf32>
    %c2_47 = arith.constant 2 : index
    %c0_48 = arith.constant 0 : index
    %c0_49 = arith.constant 0 : index
    %57 = vector.load %arg6[%c2_47, %c0_48, %c0_49] : memref<14x84x128xf32, #tpu.memory_space<vmem>>, vector<1x84x128xf32>
    %58 = vector.shape_cast %57 : vector<1x84x128xf32> to vector<84x128xf32>
    %cst_50 = arith.constant dense<0.000000e+00> : vector<1x128xf32>
    %59 = tpu.matmul %56, %58, %cst_50 {dimension_numbers = #tpu.dot_dimension_numbers<[1], [0], [0], [1], [0, 0, 1, 1], [], []>} : vector<1x84xf32>, vector<84x128xf32>, vector<1x128xf32> -> vector<1x128xf32>
    %60 = arith.addf %55, %59 : vector<1x128xf32>
    %61 = vector.extract_strided_slice %44 {offsets = [3, 0], sizes = [1, 84], strides = [1, 1]} : vector<14x84xf32> to vector<1x84xf32>
    %c3_51 = arith.constant 3 : index
    %c0_52 = arith.constant 0 : index
    %c0_53 = arith.constant 0 : index
    %62 = vector.load %arg6[%c3_51, %c0_52, %c0_53] : memref<14x84x128xf32, #tpu.memory_space<vmem>>, vector<1x84x128xf32>
    %63 = vector.shape_cast %62 : vector<1x84x128xf32> to vector<84x128xf32>
    %cst_54 = arith.constant dense<0.000000e+00> : vector<1x128xf32>
    %64 = tpu.matmul %61, %63, %cst_54 {dimension_numbers = #tpu.dot_dimension_numbers<[1], [0], [0], [1], [0, 0, 1, 1], [], []>} : vector<1x84xf32>, vector<84x128xf32>, vector<1x128xf32> -> vector<1x128xf32>
    %65 = arith.addf %60, %64 : vector<1x128xf32>
    %66 = vector.extract_strided_slice %44 {offsets = [4, 0], sizes = [1, 84], strides = [1, 1]} : vector<14x84xf32> to vector<1x84xf32>
    %c4_55 = arith.constant 4 : index
    %c0_56 = arith.constant 0 : index
    %c0_57 = arith.constant 0 : index
    %67 = vector.load %arg6[%c4_55, %c0_56, %c0_57] : memref<14x84x128xf32, #tpu.memory_space<vmem>>, vector<1x84x128xf32>
    %68 = vector.shape_cast %67 : vector<1x84x128xf32> to vector<84x128xf32>
    %cst_58 = arith.constant dense<0.000000e+00> : vector<1x128xf32>
    %69 = tpu.matmul %66, %68, %cst_58 {dimension_numbers = #tpu.dot_dimension_numbers<[1], [0], [0], [1], [0, 0, 1, 1], [], []>} : vector<1x84xf32>, vector<84x128xf32>, vector<1x128xf32> -> vector<1x128xf32>
    %70 = arith.addf %65, %69 : vector<1x128xf32>
    %71 = vector.extract_strided_slice %44 {offsets = [5, 0], sizes = [1, 84], strides = [1, 1]} : vector<14x84xf32> to vector<1x84xf32>
    %c5 = arith.constant 5 : index
    %c0_59 = arith.constant 0 : index
    %c0_60 = arith.constant 0 : index
    %72 = vector.load %arg6[%c5, %c0_59, %c0_60] : memref<14x84x128xf32, #tpu.memory_space<vmem>>, vector<1x84x128xf32>
    %73 = vector.shape_cast %72 : vector<1x84x128xf32> to vector<84x128xf32>
    %cst_61 = arith.constant dense<0.000000e+00> : vector<1x128xf32>
    %74 = tpu.matmul %71, %73, %cst_61 {dimension_numbers = #tpu.dot_dimension_numbers<[1], [0], [0], [1], [0, 0, 1, 1], [], []>} : vector<1x84xf32>, vector<84x128xf32>, vector<1x128xf32> -> vector<1x128xf32>
    %75 = arith.addf %70, %74 : vector<1x128xf32>
    %76 = vector.extract_strided_slice %44 {offsets = [6, 0], sizes = [1, 84], strides = [1, 1]} : vector<14x84xf32> to vector<1x84xf32>
    %c6 = arith.constant 6 : index
    %c0_62 = arith.constant 0 : index
    %c0_63 = arith.constant 0 : index
    %77 = vector.load %arg6[%c6, %c0_62, %c0_63] : memref<14x84x128xf32, #tpu.memory_space<vmem>>, vector<1x84x128xf32>
    %78 = vector.shape_cast %77 : vector<1x84x128xf32> to vector<84x128xf32>
    %cst_64 = arith.constant dense<0.000000e+00> : vector<1x128xf32>
    %79 = tpu.matmul %76, %78, %cst_64 {dimension_numbers = #tpu.dot_dimension_numbers<[1], [0], [0], [1], [0, 0, 1, 1], [], []>} : vector<1x84xf32>, vector<84x128xf32>, vector<1x128xf32> -> vector<1x128xf32>
    %80 = arith.addf %75, %79 : vector<1x128xf32>
    %81 = vector.extract_strided_slice %44 {offsets = [7, 0], sizes = [1, 84], strides = [1, 1]} : vector<14x84xf32> to vector<1x84xf32>
    %c7 = arith.constant 7 : index
    %c0_65 = arith.constant 0 : index
    %c0_66 = arith.constant 0 : index
    %82 = vector.load %arg6[%c7, %c0_65, %c0_66] : memref<14x84x128xf32, #tpu.memory_space<vmem>>, vector<1x84x128xf32>
    %83 = vector.shape_cast %82 : vector<1x84x128xf32> to vector<84x128xf32>
    %cst_67 = arith.constant dense<0.000000e+00> : vector<1x128xf32>
    %84 = tpu.matmul %81, %83, %cst_67 {dimension_numbers = #tpu.dot_dimension_numbers<[1], [0], [0], [1], [0, 0, 1, 1], [], []>} : vector<1x84xf32>, vector<84x128xf32>, vector<1x128xf32> -> vector<1x128xf32>
    %85 = arith.addf %80, %84 : vector<1x128xf32>
    %86 = vector.extract_strided_slice %44 {offsets = [8, 0], sizes = [1, 84], strides = [1, 1]} : vector<14x84xf32> to vector<1x84xf32>
    %c8 = arith.constant 8 : index
    %c0_68 = arith.constant 0 : index
    %c0_69 = arith.constant 0 : index
    %87 = vector.load %arg6[%c8, %c0_68, %c0_69] : memref<14x84x128xf32, #tpu.memory_space<vmem>>, vector<1x84x128xf32>
    %88 = vector.shape_cast %87 : vector<1x84x128xf32> to vector<84x128xf32>
    %cst_70 = arith.constant dense<0.000000e+00> : vector<1x128xf32>
    %89 = tpu.matmul %86, %88, %cst_70 {dimension_numbers = #tpu.dot_dimension_numbers<[1], [0], [0], [1], [0, 0, 1, 1], [], []>} : vector<1x84xf32>, vector<84x128xf32>, vector<1x128xf32> -> vector<1x128xf32>
    %90 = arith.addf %85, %89 : vector<1x128xf32>
    %91 = vector.extract_strided_slice %44 {offsets = [9, 0], sizes = [1, 84], strides = [1, 1]} : vector<14x84xf32> to vector<1x84xf32>
    %c9 = arith.constant 9 : index
    %c0_71 = arith.constant 0 : index
    %c0_72 = arith.constant 0 : index
    %92 = vector.load %arg6[%c9, %c0_71, %c0_72] : memref<14x84x128xf32, #tpu.memory_space<vmem>>, vector<1x84x128xf32>
    %93 = vector.shape_cast %92 : vector<1x84x128xf32> to vector<84x128xf32>
    %cst_73 = arith.constant dense<0.000000e+00> : vector<1x128xf32>
    %94 = tpu.matmul %91, %93, %cst_73 {dimension_numbers = #tpu.dot_dimension_numbers<[1], [0], [0], [1], [0, 0, 1, 1], [], []>} : vector<1x84xf32>, vector<84x128xf32>, vector<1x128xf32> -> vector<1x128xf32>
    %95 = arith.addf %90, %94 : vector<1x128xf32>
    %96 = vector.extract_strided_slice %44 {offsets = [10, 0], sizes = [1, 84], strides = [1, 1]} : vector<14x84xf32> to vector<1x84xf32>
    %c10 = arith.constant 10 : index
    %c0_74 = arith.constant 0 : index
    %c0_75 = arith.constant 0 : index
    %97 = vector.load %arg6[%c10, %c0_74, %c0_75] : memref<14x84x128xf32, #tpu.memory_space<vmem>>, vector<1x84x128xf32>
    %98 = vector.shape_cast %97 : vector<1x84x128xf32> to vector<84x128xf32>
    %cst_76 = arith.constant dense<0.000000e+00> : vector<1x128xf32>
    %99 = tpu.matmul %96, %98, %cst_76 {dimension_numbers = #tpu.dot_dimension_numbers<[1], [0], [0], [1], [0, 0, 1, 1], [], []>} : vector<1x84xf32>, vector<84x128xf32>, vector<1x128xf32> -> vector<1x128xf32>
    %100 = arith.addf %95, %99 : vector<1x128xf32>
    %101 = vector.extract_strided_slice %44 {offsets = [11, 0], sizes = [1, 84], strides = [1, 1]} : vector<14x84xf32> to vector<1x84xf32>
    %c11 = arith.constant 11 : index
    %c0_77 = arith.constant 0 : index
    %c0_78 = arith.constant 0 : index
    %102 = vector.load %arg6[%c11, %c0_77, %c0_78] : memref<14x84x128xf32, #tpu.memory_space<vmem>>, vector<1x84x128xf32>
    %103 = vector.shape_cast %102 : vector<1x84x128xf32> to vector<84x128xf32>
    %cst_79 = arith.constant dense<0.000000e+00> : vector<1x128xf32>
    %104 = tpu.matmul %101, %103, %cst_79 {dimension_numbers = #tpu.dot_dimension_numbers<[1], [0], [0], [1], [0, 0, 1, 1], [], []>} : vector<1x84xf32>, vector<84x128xf32>, vector<1x128xf32> -> vector<1x128xf32>
    %105 = arith.addf %100, %104 : vector<1x128xf32>
    %106 = vector.extract_strided_slice %44 {offsets = [12, 0], sizes = [1, 84], strides = [1, 1]} : vector<14x84xf32> to vector<1x84xf32>
    %c12 = arith.constant 12 : index
    %c0_80 = arith.constant 0 : index
    %c0_81 = arith.constant 0 : index
    %107 = vector.load %arg6[%c12, %c0_80, %c0_81] : memref<14x84x128xf32, #tpu.memory_space<vmem>>, vector<1x84x128xf32>
    %108 = vector.shape_cast %107 : vector<1x84x128xf32> to vector<84x128xf32>
    %cst_82 = arith.constant dense<0.000000e+00> : vector<1x128xf32>
    %109 = tpu.matmul %106, %108, %cst_82 {dimension_numbers = #tpu.dot_dimension_numbers<[1], [0], [0], [1], [0, 0, 1, 1], [], []>} : vector<1x84xf32>, vector<84x128xf32>, vector<1x128xf32> -> vector<1x128xf32>
    %110 = arith.addf %105, %109 : vector<1x128xf32>
    %111 = vector.extract_strided_slice %44 {offsets = [13, 0], sizes = [1, 84], strides = [1, 1]} : vector<14x84xf32> to vector<1x84xf32>
    %c13 = arith.constant 13 : index
    %c0_83 = arith.constant 0 : index
    %c0_84 = arith.constant 0 : index
    %112 = vector.load %arg6[%c13, %c0_83, %c0_84] : memref<14x84x128xf32, #tpu.memory_space<vmem>>, vector<1x84x128xf32>
    %113 = vector.shape_cast %112 : vector<1x84x128xf32> to vector<84x128xf32>
    %cst_85 = arith.constant dense<0.000000e+00> : vector<1x128xf32>
    %114 = tpu.matmul %111, %113, %cst_85 {dimension_numbers = #tpu.dot_dimension_numbers<[1], [0], [0], [1], [0, 0, 1, 1], [], []>} : vector<1x84xf32>, vector<84x128xf32>, vector<1x128xf32> -> vector<1x128xf32>
    %115 = arith.addf %110, %114 : vector<1x128xf32>
    %cst_86 = arith.constant 0.000000e+00 : f32
    %116 = vector.broadcast %cst_86 : f32 to vector<1x128xf32>
    %117 = arith.maximumf %115, %116 : vector<1x128xf32>
    %c0_87 = arith.constant 0 : index
    %c0_88 = arith.constant 0 : index
    %118 = vector.load %arg8[%c0_87, %c0_88] : memref<128x128xf32, #tpu.memory_space<vmem>>, vector<128x128xf32>
    %cst_89 = arith.constant dense<0.000000e+00> : vector<1x128xf32>
    %119 = tpu.matmul %117, %118, %cst_89 {dimension_numbers = #tpu.dot_dimension_numbers<[1], [0], [0], [1], [0, 0, 1, 1], [], []>} : vector<1x128xf32>, vector<128x128xf32>, vector<1x128xf32> -> vector<1x128xf32>
    %c0_90 = arith.constant 0 : index
    %c0_91 = arith.constant 0 : index
    %120 = vector.load %arg9[%c0_90, %c0_91] : memref<1x128xf32, #tpu.memory_space<vmem>>, vector<1x128xf32>
    %121 = arith.addf %119, %120 : vector<1x128xf32>
    %cst_92 = arith.constant 0.000000e+00 : f32
    %122 = vector.broadcast %cst_92 : f32 to vector<1x128xf32>
    %123 = arith.maximumf %121, %122 : vector<1x128xf32>
    %c0_93 = arith.constant 0 : index
    %c0_94 = arith.constant 0 : index
    %124 = vector.load %arg10[%c0_93, %c0_94] : memref<128x128xf32, #tpu.memory_space<vmem>>, vector<128x128xf32>
    %cst_95 = arith.constant dense<0.000000e+00> : vector<1x128xf32>
    %125 = tpu.matmul %123, %124, %cst_95 {dimension_numbers = #tpu.dot_dimension_numbers<[1], [0], [0], [1], [0, 0, 1, 1], [], []>} : vector<1x128xf32>, vector<128x128xf32>, vector<1x128xf32> -> vector<1x128xf32>
    %c0_96 = arith.constant 0 : index
    %c0_97 = arith.constant 0 : index
    %126 = vector.load %arg11[%c0_96, %c0_97] : memref<1x128xf32, #tpu.memory_space<vmem>>, vector<1x128xf32>
    %127 = arith.addf %125, %126 : vector<1x128xf32>
    %c0_98 = arith.constant 0 : index
    %c0_99 = arith.constant 0 : index
    %c0_100 = arith.constant 0 : index
    %128 = vector.load %arg12[%c0_98, %c0_99, %c0_100] : memref<1x1x128xf32, #tpu.memory_space<vmem>>, vector<1x1x128xf32>
    %129 = vector.shape_cast %128 : vector<1x1x128xf32> to vector<1x128xf32>
    %130 = vector.shape_cast %127 : vector<1x128xf32> to vector<1x1x128xf32>
    tpu.vector_store %arg12[%c0_98, %c0_99, %c0_100], %130 {strides = array<i32>} : memref<1x1x128xf32, #tpu.memory_space<vmem>>, vector<1x1x128xf32>,
    return
  }
  func.func @transform_0(%arg0: i32) -> (i32, i32, i32, i32) {
    %c0_i32 = arith.constant 0 : i32
    %c0_i32_0 = arith.constant 0 : i32
    %c0_i32_1 = arith.constant 0 : i32
    %c0_i32_2 = arith.constant 0 : i32
    return %arg0, %c0_i32, %c0_i32_0, %c0_i32_1 : i32, i32, i32, i32
  }
  func.func @transform_1(%arg0: i32) -> (i32, i32, i32) {
    %c0_i32 = arith.constant 0 : i32
    %c0_i32_0 = arith.constant 0 : i32
    %c0_i32_1 = arith.constant 0 : i32
    %c0_i32_2 = arith.constant 0 : i32
    return %c0_i32, %c0_i32_0, %c0_i32_1 : i32, i32, i32
  }
  func.func @transform_2(%arg0: i32) -> (i32, i32) {
    %c0_i32 = arith.constant 0 : i32
    %c0_i32_0 = arith.constant 0 : i32
    %c0_i32_1 = arith.constant 0 : i32
    return %c0_i32, %c0_i32_0 : i32, i32
  }
  func.func @transform_3(%arg0: i32) -> (i32, i32, i32) {
    %c0_i32 = arith.constant 0 : i32
    %c0_i32_0 = arith.constant 0 : i32
    %c0_i32_1 = arith.constant 0 : i32
    %c0_i32_2 = arith.constant 0 : i32
    return %c0_i32, %c0_i32_0, %c0_i32_1 : i32, i32, i32
  }
  func.func @transform_4(%arg0: i32) -> (i32, i32, i32) {
    %c0_i32 = arith.constant 0 : i32
    %c0_i32_0 = arith.constant 0 : i32
    %c0_i32_1 = arith.constant 0 : i32
    %c0_i32_2 = arith.constant 0 : i32
    return %c0_i32, %c0_i32_0, %c0_i32_1 : i32, i32, i32
  }
  func.func @transform_5(%arg0: i32) -> (i32, i32, i32) {
    %c0_i32 = arith.constant 0 : i32
    %c0_i32_0 = arith.constant 0 : i32
    %c0_i32_1 = arith.constant 0 : i32
    %c0_i32_2 = arith.constant 0 : i32
    return %c0_i32, %c0_i32_0, %c0_i32_1 : i32, i32, i32
  }
  func.func @transform_6(%arg0: i32) -> (i32, i32) {
    %c0_i32 = arith.constant 0 : i32
    %c0_i32_0 = arith.constant 0 : i32
    %c0_i32_1 = arith.constant 0 : i32
    return %c0_i32, %c0_i32_0 : i32, i32
  }
  func.func @transform_7(%arg0: i32) -> (i32, i32) {
    %c0_i32 = arith.constant 0 : i32
    %c0_i32_0 = arith.constant 0 : i32
    %c0_i32_1 = arith.constant 0 : i32
    return %c0_i32, %c0_i32_0 : i32, i32
  }
  func.func @transform_8(%arg0: i32) -> (i32, i32) {
    %c0_i32 = arith.constant 0 : i32
    %c0_i32_0 = arith.constant 0 : i32
    %c0_i32_1 = arith.constant 0 : i32
    return %c0_i32, %c0_i32_0 : i32, i32
  }
  func.func @transform_9(%arg0: i32) -> (i32, i32) {
    %c0_i32 = arith.constant 0 : i32
    %c0_i32_0 = arith.constant 0 : i32
    %c0_i32_1 = arith.constant 0 : i32
    return %c0_i32, %c0_i32_0 : i32, i32
  }
  func.func @transform_10(%arg0: i32) -> (i32, i32) {
    %c0_i32 = arith.constant 0 : i32
    %c0_i32_0 = arith.constant 0 : i32
    %c0_i32_1 = arith.constant 0 : i32
    return %c0_i32, %c0_i32_0 : i32, i32
  }
  func.func @transform_11(%arg0: i32) -> (i32, i32, i32) {
    %c0_i32 = arith.constant 0 : i32
    %c0_i32_0 = arith.constant 0 : i32
    %c0_i32_1 = arith.constant 0 : i32
    return %arg0, %c0_i32, %c0_i32_0 : i32, i32, i32
  }
}

</mosaic_0001>

<bundles_post_ra>
// kernel: tpu_custom_call.1
= control target key start
LH: loop header
LB: loop body
LE: loop exit
PB: predicated region body
PF: predicated region fallthrough
CT: control target
= control target key end

     0   :  { %s2874_s0 = inlined_call_operand.hbm [shape: f32[2,1,32,32], index: 0, kind: input, shape index: {}]   ;;  %s2875_s1 = inlined_call_operand.hbm [shape: f32[5,32,168], index: 1, kind: input, shape index: {}]   ;;  %s2876_s2 = inlined_call_operand.vmem [shape: f32[1,168], index: 2, kind: input, shape index: {}]   ;;  %s2877_s3 = inlined_call_operand.vmem [shape: f32[2,14,28], index: 3, kind: input, shape index: {}]   ;;  %s2878_s4 = inlined_call_operand.hbm [shape: f32[2,168,84], index: 4, kind: input, shape index: {}]   ;;  %s2879_s5 = inlined_call_operand.hbm [shape: f32[14,84,128], index: 5, kind: input, shape index: {}]   ;;  %s2880_s6 = inlined_call_operand.vmem [shape: f32[1,128], index: 6, kind: input, shape index: {}]   ;;  %s2881_s7 = inlined_call_operand.hbm [shape: f32[128,128], index: 7, kind: input, shape index: {}]   ;;  %s2882_s8 = inlined_call_operand.vmem [shape: f32[1,128], index: 8, kind: input, shape index: {}]   ;;  %s2883_s9 = inlined_call_operand.hbm [shape: f32[128,128], index: 9, kind: input, shape index: {}]   ;;  %s2884_s10 = inlined_call_operand.vmem [shape: f32[1,128], index: 10, kind: input, shape index: {}]   ;;  %s2885_s11 = inlined_call_operand.hbm [shape: f32[2,1,128], index: 11, kind: output, shape index: {}]  }
   0x1   :  { %2888 = sst [smem:[#allocation19_spill]] %s2875_s1 }
   0x2   :  { %2889 = sst [smem:[#allocation20_spill]] %s2878_s4 }
   0x3   :  { %2890 = sst [smem:[#allocation21_spill]] %s2879_s5 }
   0x4   :  { %2891 = sst [smem:[#allocation22_spill]] %s2881_s7 }
   0x5   :  { %2892 = sst [smem:[#allocation23_spill]] %s2883_s9 }
   0x6   :  { %16 = vsyncpa [#allocation3], 0 }
   0x7   :  { %18 = vsyncpa [#allocation3 + $0x1], 0 }
   0x8   :  { %19 = vsyncpa [#allocation6], 0 }
   0x9   :  { %20 = vsyncpa [#allocation9], 0 }
   0xa   :  { %21 = vsyncpa [#allocation12], 0 }
   0xb   :  { %22 = vsyncpa [#allocation4], 0 }
   0xc   :  { %24 = vsyncpa [#allocation4 + $0x1], 0  ;;  %s2510_s17 = smov 0   ;;  %s2512_s18 = smov 0  }
   0xd   :  { %s2514_s19 = smov 0   ;;  %s2516_s20 = smov 0  }
   0xe LB: > { %s2893_s1 = sld [smem:[#allocation19_spill]]  ;;  %s2534_s24 = sadd.s32 4294967295, %s2439_s20   ;;  %s2439_s20 = sphi %s2516_s20, %s2910_s20   ;;  %s2435_s19 = sphi %s2514_s19, %s2909_s19   ;;  %s2431_s18 = sphi %s2512_s18, %s2908_s18   ;;  %s2427_s17 = sphi %s2510_s17, %s2907_s17  }
   0xf   : > { %p1966_p0 = scmp.ge.s32.totalorder %s2439_s20, 1  ;;  %p51_p1 = scmp.eq.s32.totalorder %s2534_s24, 0 }
  0x10   : > { %p297_p2 = scmp.lt.s32.totalorder %s2439_s20, 3  ;;  %s2441_s26 = smov [#allocation5]  }
  0x11   : > { %s310_s27 = sshll.u32 %s2441_s26, 4  ;;  %s2896_s5 = sld [smem:[#allocation21_spill]]  ;;  %s311_s27 = int_to_ptr.vmem [resolvable:$true] %s310_s27 }
  0x12   : > { %p2539_p3 = pnand %p1966_p0, %p297_p2  ;;  %s2442_s13 = smov 256  }
  0x13   : > { %s2443_s14 = smov 16   ;;  %s2444_s15 = smov [#allocation8]  }
  0x14   : > { %s308_s23 = sshll.u32 %s2893_s1, 4  ;;  %p2104_p4 = pneg %p2539_p3  ;;  %s309_s23 = int_to_ptr.hbm [resolvable:$true] %s308_s23 }
  0x15   : > { %s344_s16 = sshll.u32 %s2444_s15, 4  ;;  %s2897_s4 = sld [smem:[#allocation20_spill]]  ;;  %s345_s16 = int_to_ptr.vmem [resolvable:$true] %s344_s16 }
  0x16   : > { %p2548_p6 = pnand %p2104_p4, %p51_p1  ;;  %s2886_s1 = smov 128  }
  0x17   : > { %s342_s12 = sshll.u32 %s2896_s5, 4  ;;  %s2887_s29 = smov 8   ;;  %s343_s12 = int_to_ptr.hbm [resolvable:$true] %s342_s12 }
  0x18   : > { %2107 = dma.hbm_to_vmem [thread:$0]  (!%p2548_p6), %s309_s23, 5120, %s311_s27, [#allocation6], %s2442_s13, %s2442_s13, %s2443_s14  }
  0x19   : > { %2113 = dma.hbm_to_vmem [thread:$0]  (!%p2548_p6), %s343_s12, 19712, %s345_s16, [#allocation9], %s2886_s1, %s2886_s1, %s2887_s29  }
  0x1a   : > { %s2898_s7 = sld [smem:[#allocation22_spill]]  ;;  %s2447_s27 = smov [#allocation7]  }
  0x1b   : > { %s328_s26 = sshll.u32 %s2897_s4, 4  ;;  %s330_s13 = sshll.u32 %s2447_s27, 4  ;;  %s329_s26 = int_to_ptr.hbm [resolvable:$true] %s328_s26  ;;  %s331_s13 = int_to_ptr.vmem [resolvable:$true] %s330_s13 }
  0x1c   : > { %2110 = dma.hbm_to_vmem [thread:$0]  (!%p2548_p6), %s329_s26, 5376, %s331_s13, [#allocation6], %s2886_s1, %s2886_s1, %s2887_s29  }
  0x1d   : > { %s2448_s12 = smov [#allocation10]   ;;  %s2899_s9 = sld [smem:[#allocation23_spill]] }
  0x1e   : > { %s361_s5 = sshll.u32 %s2448_s12, 4  ;;  %s2449_s21 = smov [#allocation11]   ;;  %s362_s5 = int_to_ptr.vmem [resolvable:$true] %s361_s5 }
  0x1f   : > { %s378_s22 = sshll.u32 %s2449_s21, 4  ;;  %s1965_s26 = sadd.s32 4294967294, %s2439_s20   ;;  %s379_s22 = int_to_ptr.vmem [resolvable:$true] %s378_s22 }
  0x20   : > { %s359_s23 = sshll.u32 %s2898_s7, 4  ;;  %s2588_s30 = sadd.s32 1, %s2439_s20   ;;  %s360_s23 = int_to_ptr.hbm [resolvable:$true] %s359_s23 }
  0x21   : > { %2116 = dma.hbm_to_vmem [thread:$0]  (!%p2548_p6), %s360_s23, 2048, %s362_s5, [#allocation9], %s2886_s1, %s2886_s1, %s2887_s29  }
  0x22   : > { %s37_s27 = sadd.s32 1, %s2435_s19  ;;  %s34_s13 = ssub.s32 %s2439_s20, %s2588_s30 }
  0x23   : > { %s376_s16 = sshll.u32 %s2899_s9, 4  ;;  %p44_p7 = scmp.ne.s32.totalorder %s2435_s19, %s2431_s18  ;;  %s377_s16 = int_to_ptr.hbm [resolvable:$true] %s376_s16 }
  0x24   : > { %2119 = dma.hbm_to_vmem [thread:$0]  (!%p2548_p6), %s377_s16, 2048, %s379_s22, [#allocation12], %s2886_s1, %s2886_s1, %s2887_s29  }
  0x25   : > { %p35_p8 = scmp.eq.s32.totalorder %s34_s13, 0  ;;  %p45_p9 = scmp.eq.s32.totalorder %s2439_s20, 0 }
  0x26   : > { %p50_p10 = scmp.ne.s32.totalorder %s2431_s18, %s2427_s17  ;;  %p284_p11 = scmp.eq.s32.totalorder %s2534_s24, 1 }
  0x27   : > { %s2600_s23 = scalar_select %p35_p8, %s2435_s19, %s37_s27  }
  0x28   : > { %p2604_p12 = por %p51_p1, %p50_p10  ;;  %p2608_p13 = por %p284_p11, %p44_p7 }
  0x29   : > { %p290_p0 = scmp.eq.s32.totalorder %s1965_s26, 1  ;;  %p46_p2 = por %p45_p9, %p44_p7 }
  0x2a   : > { %s395_s5 = sand.u32 1, %s2435_s19   ;;  %p2133_p6 = scmp.lt.s32.totalorder %s2439_s20, 2 }
  0x2b   : > { %p2613_p4 = por %p290_p0, %p50_p10  ;;  %s1973_s15 = sshll.u32 %s395_s5, 5 }
  0x2c   : > { %s2071_s16 = sshll.u32 %s2439_s20, 5  ;;  %s399_s1 = scalar_lea.vmem [#allocation2], %s1973_s15 }
  0x2d   : > { %s404_s27 = scalar_lea.hbm %s2874_s0, %s2071_s16  ;;  %s407_s29 = sshll.u32 %s399_s1, 4  ;;  %s408_s29 = int_to_ptr.vmem [resolvable:$true] %s407_s29 }
  0x2e   : > { %s405_s13 = sshll.u32 %s404_s27, 4  ;;  %p2622_p8 = pnand %p2133_p6, %p46_p2  ;;  %s406_s13 = int_to_ptr.hbm [resolvable:$true] %s405_s13 }
  0x2f   : > { %s396_s4 = scalar_lea.sflag [#allocation3], %s395_s5  ;;  %s2331_s7 = sshra.s32 %s406_s13, 4  ;;  %s2332_s7 = int_to_ptr.hbm [resolvable:$true] %s2331_s7 }
  0x30   : > { %s2333_s9 = scalar_lea.hbm %s2332_s7, 32  ;;  %p2335_p9 = pneg %p2622_p8 }
  0x31   : > { %p2334_p7 = scmp.ne.s32.totalorder %s2332_s7, %s2333_s9  ;;  %s2338_s1 = scalar_lea.hbm %s2874_s0, 64 }
  0x32   : > { %p2339_p0 = scmp.lt.s32.totalorder %s2332_s7, %s2874_s0  ;;  %p2340_p2 = scmp.lt.s32.totalorder %s2338_s1, %s2333_s9 }
  0x33   : > { %p2336_p10 = pnand %p2335_p9, %p2334_p7 }
  0x34   : > { %p2341_p6 = por %p2340_p2, %p2339_p0 }
  0x35   : > { %p2337_p11 = pneg %p2336_p10 }
  0x37   : > { %p2342_p5 = pnand %p2341_p6, %p2337_p11 }
  0x39   : > { %2345 = shalt.err (!%p2342_p5)
}
  0x3a   : > { %s2904_s5 = smov 8   ;;  %s2905_s27 = smov 128  }
  0x3b   : > { %2123 = dma.hbm_to_vmem [thread:$0]  (!%p2622_p8), %s406_s13, 512, %s408_s29, %s396_s4, %s2905_s27, %s2905_s27, %s2904_s5  }
  0x3c   : > { %419 = sbr.rel (%p2539_p3) target bundleno = 1057 (0x421), region = 64  ;;  %s2642_s16 = sand.u32 (!%p2539_p3), 1, %s2431_s18  }
  0x3d   : > { %s1977_s7 = sshll.u32 (!%p2539_p3), %s2642_s16, 5  ;;  %s422_s9 = scalar_lea.sflag (!%p2539_p3), [#allocation3], %s2642_s16 }
  0x3e   : > { %s2646_s21 = scalar_lea.vmem (!%p2539_p3), [#allocation2], %s1977_s7 }
  0x41   : > { %2406 = dma.done.wait (%p2604_p12), %s422_s9, 512  }
  0x42   : > { %2408 = vsyncadd (%p2604_p12), %s422_s9, 4294966784 }
  0x43   : > { %2410 = dma.done.wait (%p51_p1), [#allocation6], 10496  }
  0x44   : > { %2412 = vsyncadd (%p51_p1), [#allocation6], 4294956800 }
  0x45   : > { %2414 = dma.done.wait (%p51_p1), [#allocation9], 21760  }
  0x46   : > { %2416 = vsyncadd (%p51_p1), [#allocation9], 4294945536 }
  0x47   : > { %2418 = dma.done.wait (%p51_p1), [#allocation12], 2048  }
  0x48   : > { %2420 = vsyncadd (%p51_p1), [#allocation12], 4294965248  ;;  %v508_v0 = vld [vmem:[#allocation5 + $0x70] sm:$0xff]  ;;  %v509_v1 = vld [vmem:[#allocation5 + $0x78] sm:$0xff]  ;;  %vm514_vm0 = vcmask 1046528   ;;  %vm522_vm1 = vcmask 261120   ;;  %s1847_s29 = scalar_lea.hbm %s2885_s11, %s2534_s24 }
  0x49   : > { %v500_v2 = vld [vmem:[#allocation5 + $0x38] sm:$0xff]  ;;  %543 = vmatpush.msra.mxu0 %v508_v0  ;;  %572 = vmatpush.msra.mxu1 %v509_v1  ;;  %v506_v3 = vld [vmem:[#allocation5 + $0x60] sm:$0xff]  ;;  %v507_v4 = vld [vmem:[#allocation5 + $0x68] sm:$0xff]  ;;  %vm755_vm2 = vcmask 1044480   ;;  %vm846_vm3 = vcmask 1043456   ;;  %vm664_vm4 = vcmask 1045504  }
  0x4a   : > { %v498_v5 = vld [vmem:[#allocation5 + $0x28] sm:$0xff]  ;;  %638 = vmatpush.msra.mxu3 %v500_v2  ;;  %v504_v6 = vld [vmem:[#allocation5 + $0x50] sm:$0xff]  ;;  %v505_v7 = vld [vmem:[#allocation5 + $0x58] sm:$0xff]  ;;  %vm952_vm5 = vcmask 228352   ;;  %vm1091_vm6 = vcmask 326656   ;;  %vm1226_vm7 = vcmask 687104  }
  0x4b   : > { %544 = vmatpush.msra.mxu0 %v506_v3  ;;  %573 = vmatpush.msra.mxu1 %v507_v4  ;;  %v496_v8 = vld [vmem:[#allocation5 + $0x18] sm:$0xff]  ;;  %v502_v9 = vld [vmem:[#allocation5 + $0x40] sm:$0xff]  ;;  %v503_v10 = vld [vmem:[#allocation5 + $0x48] sm:$0xff]  ;;  %s488_s26 = scalar_lea.vmem [#allocation13], %s2642_s16  ;;  %s1851_s15 = sshll.u32 %s1847_s29, 4  ;;  %s1852_s15 = int_to_ptr.hbm [resolvable:$true] %s1851_s15 }
  0x4c   : > { %639 = vmatpush.msra.mxu3 %v498_v5  ;;  %v2665_v11 = vld [vmem:[%s2646_s21] sm:$0xff]  ;;  %v2668_v12 = vld [vmem:[%s2646_s21 + $0x8] sm:$0xff]  ;;  %v499_v13 = vld [vmem:[#allocation5 + $0x30] sm:$0xff]  ;;  %s1849_s1 = sshll.u32 %s488_s26, 4  ;;  %s1839_s22 = scalar_lea.sflag [#allocation4], %s2642_s16  ;;  %s1850_s1 = int_to_ptr.vmem [resolvable:$true] %s1849_s1 }
  0x4d   : > { %545 = vmatpush.msra.mxu0 %v504_v6  ;;  %574 = vmatpush.msra.mxu1 %v505_v7  ;;  %v494_v14 = vld [vmem:[#allocation5 + $0x8] sm:$0xff]  ;;  %v515_v15 = vrot.slane %v2665_v11, 1  ;;  %v516_v16 = vrot.slane %v2668_v12, 1  ;;  %v2673_v17 = vld [vmem:[%s2646_s21 + $0x10] sm:$0xff]  ;;  %v497_v19 = vld [vmem:[#allocation5 + $0x20] sm:$0xff]  ;;  %v756_v42 = vrot.slane %v2665_v11, 3 }
  0x4e   : > { %640 = vmatpush.msra.mxu3 %v496_v8  ;;  %2073 = vmatpush.msra.mxu2 %v499_v13  ;;  %v754_v20 = vld [vmem:[#allocation5 + $0xf8] sm:$0xff]  ;;  %v495_v21 = vld [vmem:[#allocation5 + $0x10] sm:$0xff]  ;;  %v518_v22 = vrot.slane %v2673_v17, 1  ;;  %v752_v23 = vld [vmem:[#allocation5 + $0xe8] sm:$0xff]  ;;  %v757_v43 = vrot.slane %v2668_v12, 3  ;;  %v759_v46 = vrot.slane %v2673_v17, 3 }
  0x4f   : > { %546 = vmatpush.msra.mxu0 %v502_v9  ;;  %575 = vmatpush.msra.mxu1 %v503_v10  ;;  %v517_v18 = vsel %vm514_vm0, %v515_v15, %v516_v16  ;;  %v493_v24 = vld [vmem:[#allocation5] sm:$0xff]  ;;  %v753_v26 = vld [vmem:[#allocation5 + $0xf0] sm:$0xff]  ;;  %v2683_v27 = vld [vmem:[%s2646_s21 + $0x18] sm:$0xff]  ;;  %v665_v48 = vrot.slane %v2665_v11, 2  ;;  %v666_v49 = vrot.slane %v2668_v12, 2  ;;  %v847_v54 = vrot.slane %v2665_v11, 4 }
  0x50   : > { %641 = vmatpush.msra.mxu3 %v494_v14  ;;  %1983 = vmatmul.msk.f32.vlgmr.msra.gmra.mxu0 %vm522_vm1, %v517_v18  ;;  %v519_v25 = vsel %vm514_vm0, %v516_v16, %v518_v22  ;;  %v751_v28 = vld [vmem:[#allocation5 + $0xe0] sm:$0xff]  ;;  %v662_v29 = vld [vmem:[#allocation5 + $0xb0] sm:$0xff]  ;;  %v520_v30 = vrot.slane %v2683_v27, 1  ;;  %v663_v31 = vld [vmem:[#allocation5 + $0xb8] sm:$0xff]  ;;  %v758_v45 = vsel %vm755_vm2, %v756_v42, %v757_v43  ;;  %v760_v47 = vsel %vm755_vm2, %v757_v43, %v759_v46  ;;  %s2375_s5 = sshra.s32 %s1852_s15, 4  ;;  %s2381_s9 = scalar_lea.hbm %s2885_s11, 2  ;;  %s2376_s5 = int_to_ptr.hbm [resolvable:$true] %s2375_s5 }
  0x51   : > { %1987 = vmatmul.msk.f32.vlgmr.msra.gmra.mxu1 %vm522_vm1, %v517_v18  ;;  %1995 = vmatmul.msk.f32.vlgmr.msra.gmra.mxu3 %vm522_vm1, %v2665_v11  ;;  %v750_v32 = vld [vmem:[#allocation5 + $0xd8] sm:$0xff]  ;;  %v749_v33 = vld [vmem:[#allocation5 + $0xd0] sm:$0xff]  ;;  %v660_v34 = vld [vmem:[#allocation5 + $0xa0] sm:$0xff]  ;;  %v761_v50 = vrot.slane %v2683_v27, 3  ;;  %v848_v55 = vrot.slane %v2668_v12, 4  ;;  %v667_v61 = vsel %vm664_vm4, %v665_v48, %v666_v49  ;;  %v668_v0 = vrot.slane %v2673_v17, 2  ;;  %p2382_p12 = scmp.lt.s32.totalorder %s2376_s5, %s2885_s11 }
  0x52   : > { %2075 = vmatpush.msra.mxu2 %v497_v19  ;;  %609 = vmatpush.msrb.mxu0 %v499_v13  ;;  %v661_v35 = vld [vmem:[#allocation5 + $0xa8] sm:$0xff]  ;;  %v658_v37 = vld [vmem:[#allocation5 + $0x90] sm:$0xff]  ;;  %v521_v38 = vsel %vm514_vm0, %v518_v22, %v520_v30  ;;  %v747_v39 = vld [vmem:[#allocation5 + $0xc0] sm:$0xff]  ;;  %v850_v1 = vrot.slane %v2673_v17, 4  ;;  %v670_v4 = vrot.slane %v2683_v27, 2  ;;  %v852_v5 = vrot.slane %v2683_v27, 4 }
  0x53   : > { %2072 = vmatpush.msrb.mxu1 %v499_v13  ;;  %812 = vmatpush.msrb.mxu3 %v754_v20  ;;  %v748_v36 = vld [vmem:[#allocation5 + $0xc8] sm:$0xff]  ;;  %v659_v40 = vld [vmem:[#allocation5 + $0x98] sm:$0xff]  ;;  %v656_v41 = vld [vmem:[#allocation5 + $0x80] sm:$0xff]  ;;  %v849_v59 = vsel %vm846_vm3, %v847_v54, %v848_v55  ;;  %v762_v60 = vsel %vm755_vm2, %v759_v46, %v761_v50  ;;  %v669_v3 = vsel %vm664_vm4, %v666_v49, %v668_v0  ;;  %s2377_s27 = scalar_lea.hbm %s2376_s5, 1 }
  0x54   : > { %2077 = vmatpush.msra.mxu2 %v495_v21  ;;  %610 = vmatpush.msrb.mxu0 %v497_v19  ;;  %v657_v44 = vld [vmem:[#allocation5 + $0x88] sm:$0xff]  ;;  %v844_v51 = vld [vmem:[#allocation5 + $0x130] sm:$0xff]  ;;  %v845_v52 = vld [vmem:[#allocation5 + $0x138] sm:$0xff]  ;;  %v851_v2 = vsel %vm846_vm3, %v848_v55, %v850_v1  ;;  %v853_v6 = vsel %vm846_vm3, %v850_v1, %v852_v5  ;;  %v671_v7 = vsel %vm664_vm4, %v668_v0, %v670_v4  ;;  %p2378_p1 = scmp.ne.s32.totalorder %s2376_s5, %s2377_s27  ;;  %p2383_p8 = scmp.lt.s32.totalorder %s2381_s9, %s2377_s27 }
  0x55   : > { %2074 = vmatpush.msrb.mxu1 %v497_v19  ;;  %813 = vmatpush.msrb.mxu3 %v752_v23  ;;  %v842_v53 = vld [vmem:[#allocation5 + $0x120] sm:$0xff]  ;;  %v843_v56 = vld [vmem:[#allocation5 + $0x128] sm:$0xff]  ;;  %v840_v57 = vld [vmem:[#allocation5 + $0x110] sm:$0xff] }
  0x56   : > { %2079 = vmatpush.msra.mxu2 %v493_v24  ;;  %611 = vmatpush.msrb.mxu0 %v495_v21  ;;  %v841_v58 = vld [vmem:[#allocation5 + $0x118] sm:$0xff]  ;;  %v839_v62 = vld [vmem:[#allocation5 + $0x108] sm:$0xff]  ;;  %v838_v63 = vld [vmem:[#allocation5 + $0x100] sm:$0xff]  ;;  %p2379_p3 = pnand %p2378_p1, %p2608_p13  ;;  %p2384_p7 = por %p2383_p8, %p2382_p12 }
  0x57   : > { %1993 = vmatmul.msk.f32.vlgmr.msra.gmra.mxu2 %vm522_vm1, %v2673_v17  ;;  %2076 = vmatpush.msrb.mxu1 %v495_v21  ;;  %v928_v0 = vld [vmem:[%s2876_s2] sm:$0x3] }
  0x58   : > { %1984 = vmatmul.msk.f32.gmra.mxu0 %vm522_vm1, %v519_v25  ;;  %783 = vmatpush.msrb.mxu2 %v753_v26  ;;  %p2380_p5 = pneg %p2379_p3 }
  0x59   : > { %1988 = vmatmul.msk.f32.gmra.mxu1 %vm522_vm1, %v519_v25  ;;  %1996 = vmatmul.msk.f32.gmra.mxu3 %vm522_vm1, %v2668_v12 }
  0x5a   : > { %612 = vmatpush.msrb.mxu0 %v493_v24  ;;  %2078 = vmatpush.msrb.mxu1 %v493_v24  ;;  %p2385_p9 = pnand %p2384_p7, %p2380_p5 }
  0x5b   : > { %784 = vmatpush.msrb.mxu2 %v751_v28  ;;  %814 = vmatpush.msrb.mxu3 %v750_v32 }
  0x5c   : > { %692 = vmatpush.msra.mxu0 %v662_v29  ;;  %721 = vmatpush.msra.mxu1 %v663_v31 }
  0x5d   : > { %785 = vmatpush.msrb.mxu2 %v749_v33  ;;  %815 = vmatpush.msrb.mxu3 %v748_v36 }
  0x5e   : > { %693 = vmatpush.msra.mxu0 %v660_v34  ;;  %722 = vmatpush.msra.mxu1 %v661_v35 }
  0x5f   : > { %1994 = vmatmul.msk.f32.gmra.mxu2 %vm522_vm1, %v2683_v27 }
  0x60   : > { %694 = vmatpush.msra.mxu0 %v658_v37  ;;  %786 = vmatpush.msrb.mxu2 %v747_v39 }
  0x61   : > { %1985 = vmatmul.msk.f32.gmra.mxu0 %vm522_vm1, %v521_v38  ;;  %1989 = vmatmul.msk.f32.gmra.mxu1 %vm522_vm1, %v521_v38 }
  0x62   : > { %1997 = vmatmul.msk.f32.gmra.mxu3 %vm522_vm1, %v2673_v17  ;;  %723 = vmatpush.msra.mxu1 %v659_v40 }
  0x63   : > { %695 = vmatpush.msra.mxu0 %v656_v41 }
  0x64   : > { %724 = vmatpush.msra.mxu1 %v657_v44 }
  0x67   : > { %2007 = vmatmul.msk.f32.vlgmr.msrb.gmra.mxu2 %vm522_vm1, %v758_v45 }
  0x69   : > { %1986 = vmatmul.msk.f32.gmra.mxu0 %vm522_vm1, %v520_v30  ;;  %1990 = vmatmul.msk.f32.gmra.mxu1 %vm522_vm1, %v520_v30 }
  0x6a   : > { %1998 = vmatmul.msk.f32.gmra.mxu3 %vm522_vm1, %v2683_v27 }
  0x6f   : > { %2008 = vmatmul.msk.f32.gmra.mxu2 %vm522_vm1, %v760_v47 }
  0x71   : > { %1991 = vmatmul.msk.f32.vlgmr.msrb.gmra.mxu0 %vm522_vm1, %v2665_v11  ;;  %1992 = vmatmul.msk.f32.vlgmr.msrb.gmra.mxu1 %vm522_vm1, %v2668_v12 }
  0x72   : > { %2011 = vmatmul.msk.f32.vlgmr.msrb.gmra.mxu3 %vm522_vm1, %v758_v45  ;;  %874 = vmatpush.msrb.mxu0 %v844_v51 }
  0x73   : > { %903 = vmatpush.msrb.mxu1 %v845_v52 }
  0x74   : > { %875 = vmatpush.msrb.mxu0 %v842_v53 }
  0x75   : > { %904 = vmatpush.msrb.mxu1 %v843_v56 }
  0x76   : > { %876 = vmatpush.msrb.mxu0 %v840_v57 }
  0x77   : > { %905 = vmatpush.msrb.mxu1 %v841_v58  ;;  %2009 = vmatmul.msk.f32.gmra.mxu2 %vm522_vm1, %v762_v60 }
  0x78   : > { %877 = vmatpush.msrb.mxu0 %v838_v63 }
  0x79   : > { %1999 = vmatmul.msk.f32.vlgmr.msra.gmra.mxu0 %vm522_vm1, %v667_v61  ;;  %906 = vmatpush.msrb.mxu1 %v839_v62 }
  0x7a   : > { %2003 = vmatmul.msk.f32.vlgmr.msra.gmra.mxu1 %vm522_vm1, %v667_v61  ;;  %2012 = vmatmul.msk.f32.gmra.mxu3 %vm522_vm1, %v760_v47 }
  0x7f   : > { %2010 = vmatmul.msk.f32.gmra.mxu2 %vm522_vm1, %v761_v50 }
  0x81   : > { %2000 = vmatmul.msk.f32.gmra.mxu0 %vm522_vm1, %v669_v3 }
  0x82   : > { %2004 = vmatmul.msk.f32.gmra.mxu1 %vm522_vm1, %v669_v3  ;;  %2013 = vmatmul.msk.f32.gmra.mxu3 %vm522_vm1, %v762_v60 }
  0x89   : > { %2001 = vmatmul.msk.f32.gmra.mxu0 %vm522_vm1, %v671_v7 }
  0x8a   : > { %2005 = vmatmul.msk.f32.gmra.mxu1 %vm522_vm1, %v671_v7  ;;  %2014 = vmatmul.msk.f32.gmra.mxu3 %vm522_vm1, %v761_v50 }
  0x91   : > { %2002 = vmatmul.msk.f32.gmra.mxu0 %vm522_vm1, %v670_v4 }
  0x92   : > { %2006 = vmatmul.msk.f32.gmra.mxu1 %vm522_vm1, %v670_v4 }
  0x99   : > { %2015 = vmatmul.msk.f32.vlgmr.msrb.gmra.mxu0 %vm522_vm1, %v849_v59 }
  0x9a   : > { %2019 = vmatmul.msk.f32.vlgmr.msrb.gmra.mxu1 %vm522_vm1, %v849_v59 }
  0xa1   : > { %2016 = vmatmul.msk.f32.gmra.mxu0 %vm522_vm1, %v851_v2 }
  0xa2   : > { %2020 = vmatmul.msk.f32.gmra.mxu1 %vm522_vm1, %v851_v2 }
  0xa9   : > { %2017 = vmatmul.msk.f32.gmra.mxu0 %vm522_vm1, %v853_v6 }
  0xaa   : > { %2021 = vmatmul.msk.f32.gmra.mxu1 %vm522_vm1, %v853_v6 }
  0xb1   : > { %2018 = vmatmul.msk.f32.gmra.mxu0 %vm522_vm1, %v852_v5 }
  0xb2   : > { %2022 = vmatmul.msk.f32.gmra.mxu1 %vm522_vm1, %v852_v5 }
  0xcd   : > { %v548_v8 = vpop.f32.mrf.mxu0 }
  0xce   : > { %v577_v9 = vpop.f32.mrf.mxu1 }
  0xd4   : > { %v643_v15 = vpop.f32.mrf.mxu3 }
  0xd5   : > { %v551_v10 = vpop.f32.mrf.mxu0  ;;  %v644_v55 = vadd.f32 %v643_v15, %v577_v9  ;;  %v930_v9 = vperm.slane %v928_v0, 0 }
  0xd6   : > { %v580_v11 = vpop.f32.mrf.mxu1 }
  0xda   : > { %v620_v23 = vpop.f32.mrf.mxu2 }
  0xdc   : > { %v646_v20 = vpop.f32.mrf.mxu3 }
  0xdd   : > { %v647_v50 = vadd.f32 %v646_v20, %v580_v11 }
  0xde   : > { %v554_v12 = vpop.f32.mrf.mxu0  ;;  %v583_v13 = vpop.f32.mrf.mxu1 }
  0xdf   : > { %v621_v43 = vadd.f32 %v620_v23, %v554_v12 }
  0xe2   : > { %v623_v27 = vpop.f32.mrf.mxu2 }
  0xe5   : > { %v649_v24 = vpop.f32.mrf.mxu3 }
  0xe6   : > { %v557_v14 = vpop.f32.mrf.mxu0  ;;  %v586_v16 = vpop.f32.mrf.mxu1  ;;  %v650_v44 = vadd.f32 %v649_v24, %v583_v13 }
  0xe7   : > { %v624_v46 = vadd.f32 %v623_v27, %v557_v14  ;;  %v931_v14 = vperm.slane %v928_v0, 1  ;;  %v1165_v0 = vld [vmem:[#allocation7 + $0x148] sm:$0xff] }
  0xea   : > { %v788_v31 = vpop.f32.mrf.mxu2 }
  0xed   : > { %v652_v28 = vpop.f32.mrf.mxu3 }
  0xee   : > { %v614_v17 = vpop.f32.mrf.mxu0  ;;  %v617_v19 = vpop.f32.mrf.mxu1  ;;  %v653_v51 = vadd.f32 %v652_v28, %v586_v16 }
  0xef   : > { %v615_v18 = vadd.f32 %v614_v17, %v548_v8  ;;  %v618_v47 = vadd.f32 %v617_v19, %v551_v10 }
  0xf2   : > { %v791_v35 = vpop.f32.mrf.mxu2 }
  0xf5   : > { %v817_v32 = vpop.f32.mrf.mxu3 }
  0xf6   : > { %v697_v21 = vpop.f32.mrf.mxu0 }
  0xf7   : > { %v726_v22 = vpop.f32.mrf.mxu1  ;;  %v738_v59 = vadd.f32 %v697_v21, %v615_v18 }
  0xf8   : > { %v739_v62 = vadd.f32 %v726_v22, %v644_v55  ;;  %v1077_v55 = vld [vmem:[#allocation7 + $0x38] sm:$0xff] }
  0xf9   : > { %v829_v8 = vadd.f32 %v788_v31, %v738_v59  ;;  %v1075_v59 = vld [vmem:[#allocation7 + $0x28] sm:$0xff] }
  0xfa   : > { %v794_v41 = vpop.f32.mrf.mxu2  ;;  %v830_v13 = vadd.f32 %v817_v32, %v739_v62  ;;  %v1090_v62 = vld [vmem:[#allocation7 + $0xa0] sm:$0xff] }
  0xfb   : > { %1132 = vmatpush.msra.mxu1 %v1090_v62  ;;  %v1255_v62 = vld [vmem:[#allocation8 + $0x58] sm:$0xff] }
  0xfd   : > { %v820_v37 = vpop.f32.mrf.mxu3 }
  0xfe   : > { %v700_v25 = vpop.f32.mrf.mxu0 }
  0xff   : > { %v729_v26 = vpop.f32.mrf.mxu1  ;;  %v740_v53 = vadd.f32 %v700_v25, %v618_v47  ;;  %v2029_v47 = vld [vmem:[%s2877_s3 + $0x10] sm:$0xff] }
 0x100   : > { %v741_v56 = vadd.f32 %v729_v26, %v647_v50  ;;  %v2030_v50 = vld [vmem:[%s2877_s3 + $0x18] sm:$0x3f] }
 0x101   : > { %v831_v1 = vadd.f32 %v791_v35, %v740_v53  ;;  %v1078_v53 = vld [vmem:[#allocation7 + $0x40] sm:$0xff] }
 0x102   : > { %v797_v58 = vpop.f32.mrf.mxu2  ;;  %v832_v4 = vadd.f32 %v820_v37, %v741_v56  ;;  %v950_v37 = vld [vmem:[%s2877_s3] sm:$0xff] }
 0x103   : > { %v1152_v56 = vld [vmem:[#allocation7 + $0xe0] sm:$0xff] }
 0x105   : > { %v823_v42 = vpop.f32.mrf.mxu3 }
 0x106   : > { %v703_v29 = vpop.f32.mrf.mxu0 }
 0x107   : > { %v732_v30 = vpop.f32.mrf.mxu1  ;;  %v742_v48 = vadd.f32 %v703_v29, %v621_v43  ;;  %v1085_v29 = vld [vmem:[#allocation7 + $0x78] sm:$0xff]  ;;  %v1160_v43 = vld [vmem:[#allocation7 + $0x120] sm:$0xff] }
 0x108   : > { %v743_v52 = vadd.f32 %v732_v30, %v650_v44  ;;  %v1084_v30 = vld [vmem:[#allocation7 + $0x70] sm:$0xff]  ;;  %1098 = vmatpush.msra.mxu0 %v1085_v29  ;;  %v1159_v44 = vld [vmem:[#allocation7 + $0x118] sm:$0xff]  ;;  %v1222_v29 = vld [vmem:[#allocation8 + $0x38] sm:$0xff] }
 0x109   : > { %v833_v60 = vadd.f32 %v794_v41, %v742_v48  ;;  %v1080_v41 = vld [vmem:[#allocation7 + $0x50] sm:$0xff]  ;;  %v1156_v48 = vld [vmem:[#allocation7 + $0x100] sm:$0xff] }
 0x10a   : > { %v834_v63 = vadd.f32 %v823_v42, %v743_v52  ;;  %1099 = vmatpush.msra.mxu0 %v1084_v30  ;;  %v951_v42 = vld [vmem:[%s2877_s3 + $0x8] sm:$0x3f]  ;;  %v1154_v52 = vld [vmem:[#allocation7 + $0xf0] sm:$0xff]  ;;  %v1341_v30 = vld [vmem:[#allocation8 + $0x148] sm:$0xff] }
 0x10d   : > { %v826_v61 = vpop.f32.mrf.mxu3 }
 0x10e   : > { %v706_v33 = vpop.f32.mrf.mxu0 }
 0x10f   : > { %v735_v34 = vpop.f32.mrf.mxu1  ;;  %v744_v54 = vadd.f32 %v706_v33, %v624_v46  ;;  %v1157_v46 = vld [vmem:[#allocation7 + $0x108] sm:$0xff] }
 0x110   : > { %v745_v57 = vadd.f32 %v735_v34, %v653_v51  ;;  %v1083_v34 = vld [vmem:[#allocation7 + $0x68] sm:$0xff] }
 0x111   : > { %v835_v2 = vadd.f32 %v797_v58, %v744_v54  ;;  %1100 = vmatpush.msra.mxu0 %v1083_v34  ;;  %v1079_v51 = vld [vmem:[#allocation7 + $0x48] sm:$0xff]  ;;  %v1151_v58 = vld [vmem:[#allocation7 + $0xd8] sm:$0xff]  ;;  %v1340_v34 = vld [vmem:[#allocation8 + $0x140] sm:$0xff] }
 0x112   : > { %v836_v5 = vadd.f32 %v826_v61, %v745_v57  ;;  %v1153_v54 = vld [vmem:[#allocation7 + $0xe8] sm:$0xff]  ;;  %v1076_v57 = vld [vmem:[#allocation7 + $0x30] sm:$0xff]  ;;  %v1074_v61 = vld [vmem:[#allocation7 + $0x20] sm:$0xff] }
 0x116   : > { %v879_v36 = vpop.f32.mrf.mxu0 }
 0x117   : > { %v908_v38 = vpop.f32.mrf.mxu1  ;;  %v920_v17 = vadd.f32 %v879_v36, %v829_v8  ;;  %v1163_v8 = vld [vmem:[#allocation7 + $0x138] sm:$0xff] }
 0x118   : > { %v921_v20 = vadd.f32 %v908_v38, %v830_v13  ;;  %v1070_v13 = vld [vmem:[#allocation7] sm:$0xff] }
 0x119   : > { %v934_v27 = vadd.f32 %v930_v9, %v920_v17  ;;  %v1225_v17 = vld [vmem:[#allocation8 + $0x50] sm:$0xf] }
 0x11a   : > { %v935_v31 = vadd.f32 %v931_v14, %v921_v20  ;;  %v1304_v20 = vld [vmem:[#allocation8 + $0x100] sm:$0xf] }
 0x11b   : > { %v942_v36 = vmax.f32 %v934_v27, 0.0  ;;  %v1302_v27 = vld [vmem:[#allocation8 + $0xf0] sm:$0xff] }
 0x11c   : > { %v943_v38 = vmax.f32 %v935_v31, 0.0  ;;  %v1262_v31 = vld [vmem:[#allocation8 + $0x90] sm:$0xff] }
 0x11e   : > { %v882_v39 = vpop.f32.mrf.mxu0 }
 0x11f   : > { %v911_v40 = vpop.f32.mrf.mxu1  ;;  %v922_v10 = vadd.f32 %v882_v39, %v831_v1  ;;  %v1082_v39 = vld [vmem:[#allocation7 + $0x60] sm:$0xff]  ;;  %v1073_v1 = vld [vmem:[#allocation7 + $0x18] sm:$0xff] }
 0x120   : > { %v923_v15 = vadd.f32 %v911_v40, %v832_v4  ;;  %v1081_v40 = vld [vmem:[#allocation7 + $0x58] sm:$0xff]  ;;  %1101 = vmatpush.msra.mxu0 %v1082_v39  ;;  %v1164_v4 = vld [vmem:[#allocation7 + $0x140] sm:$0xff] }
 0x121   : > { %v936_v23 = vadd.f32 %v930_v9, %v922_v10  ;;  %v1087_v10 = vld [vmem:[#allocation7 + $0x88] sm:$0xff]  ;;  %v1220_v39 = vld [vmem:[#allocation8 + $0x28] sm:$0xff] }
 0x122   : > { %v937_v25 = vadd.f32 %v931_v14, %v923_v15  ;;  %1102 = vmatpush.msra.mxu0 %v1081_v40  ;;  %v1145_v15 = vld [vmem:[#allocation7 + $0xa8] sm:$0xff]  ;;  %v1260_v40 = vld [vmem:[#allocation8 + $0x80] sm:$0xff] }
 0x123   : > { %v944_v33 = vmax.f32 %v936_v23, 0.0  ;;  %v1264_v23 = vld [vmem:[#allocation8 + $0xa0] sm:$0xff] }
 0x124   : > { %v945_v35 = vmax.f32 %v937_v25, 0.0  ;;  %1103 = vmatpush.msra.mxu0 %v1080_v41  ;;  %v1342_v25 = vld [vmem:[#allocation8 + $0x150] sm:$0xff]  ;;  %v1299_v41 = vld [vmem:[#allocation8 + $0xd8] sm:$0xff] }
 0x126   : > { %v885_v45 = vpop.f32.mrf.mxu0  ;;  %1104 = vmatpush.msra.mxu0 %v1079_v51  ;;  %v1297_v51 = vld [vmem:[#allocation8 + $0xc8] sm:$0xff] }
 0x127   : > { %v914_v49 = vpop.f32.mrf.mxu1  ;;  %v924_v3 = vadd.f32 %v885_v45, %v833_v60  ;;  %v1158_v45 = vld [vmem:[#allocation7 + $0x110] sm:$0xff] }
 0x128   : > { %v925_v6 = vadd.f32 %v914_v49, %v834_v63  ;;  %v1155_v49 = vld [vmem:[#allocation7 + $0xf8] sm:$0xff]  ;;  %1105 = vmatpush.msra.mxu0 %v1078_v53  ;;  %v1150_v60 = vld [vmem:[#allocation7 + $0xd0] sm:$0xff]  ;;  %v1149_v63 = vld [vmem:[#allocation7 + $0xc8] sm:$0xff] }
 0x129   : > { %v938_v18 = vadd.f32 %v930_v9, %v924_v3  ;;  %v1148_v3 = vld [vmem:[#allocation7 + $0xc0] sm:$0xff] }
 0x12a   : > { %v939_v21 = vadd.f32 %v931_v14, %v925_v6  ;;  %1106 = vmatpush.msra.mxu0 %v1077_v55  ;;  %v1072_v6 = vld [vmem:[#allocation7 + $0x10] sm:$0xff]  ;;  %v1217_v53 = vld [vmem:[#allocation8 + $0x10] sm:$0xff] }
 0x12b   : > { %v946_v28 = vmax.f32 %v938_v18, 0.0  ;;  %v1224_v18 = vld [vmem:[#allocation8 + $0x48] sm:$0xff]  ;;  %v1296_v55 = vld [vmem:[#allocation8 + $0xc0] sm:$0xff] }
 0x12c   : > { %v947_v32 = vmax.f32 %v939_v21, 0.0  ;;  %1107 = vmatpush.msra.mxu0 %v1076_v57  ;;  %v1343_v21 = vld [vmem:[#allocation8 + $0x158] sm:$0xf]  ;;  %v1216_v57 = vld [vmem:[#allocation8 + $0x8] sm:$0xff] }
 0x12e   : > { %v888_v7 = vpop.f32.mrf.mxu0  ;;  %1108 = vmatpush.msra.mxu0 %v1075_v59  ;;  %v1295_v59 = vld [vmem:[#allocation8 + $0xb8] sm:$0xff] }
 0x12f   : > { %v926_v11 = vadd.f32 %v888_v7, %v835_v2  ;;  %v917_v12 = vpop.f32.mrf.mxu1  ;;  %v1089_v2 = vld [vmem:[#allocation7 + $0x98] sm:$0xff] }
 0x130   : > { %v927_v16 = vadd.f32 %v917_v12, %v836_v5  ;;  %1109 = vmatpush.msra.mxu0 %v1074_v61  ;;  %v1088_v5 = vld [vmem:[#allocation7 + $0x90] sm:$0xff]  ;;  %1133 = vmatpush.msra.mxu1 %v1089_v2  ;;  %v1147_v7 = vld [vmem:[#allocation7 + $0xb8] sm:$0xff] }
 0x131   : > { %v940_v19 = vadd.f32 %v930_v9, %v926_v11  ;;  %v1071_v9 = vld [vmem:[#allocation7 + $0x8] sm:$0xff]  ;;  %v1146_v11 = vld [vmem:[#allocation7 + $0xb0] sm:$0xff] }
 0x132   : > { %v941_v22 = vadd.f32 %v931_v14, %v927_v16  ;;  %1110 = vmatpush.msra.mxu0 %v1073_v1  ;;  %1134 = vmatpush.msra.mxu1 %v1088_v5  ;;  %v1162_v12 = vld [vmem:[#allocation7 + $0x130] sm:$0xff]  ;;  %v1086_v14 = vld [vmem:[#allocation7 + $0x80] sm:$0xff]  ;;  %v1161_v16 = vld [vmem:[#allocation7 + $0x128] sm:$0xff] }
 0x133   : > { %v948_v24 = vmax.f32 %v940_v19, 0.0  ;;  %v1265_v19 = vld [vmem:[#allocation8 + $0xa8] sm:$0xf]  ;;  %v1215_v61 = vld [vmem:[#allocation8] sm:$0xff]  ;;  %v1382_v5 = vld [vmem:[#allocation8 + $0x1b0] sm:$0xf] }
 0x134   : > { %v949_v26 = vmax.f32 %v941_v22, 0.0  ;;  %1111 = vmatpush.msra.mxu0 %v1072_v6  ;;  %1135 = vmatpush.msra.mxu1 %v1087_v10  ;;  %v1223_v22 = vld [vmem:[#allocation8 + $0x40] sm:$0xff]  ;;  %v1421_v6 = vld [vmem:[#allocation8 + $0x208] sm:$0xf] }
 0x135   : > { %2023 = vmatpush.msk.msra.mxu2 %vm846_vm3, %v948_v24  ;;  %v1420_v10 = vld [vmem:[#allocation8 + $0x200] sm:$0xff] }
 0x136   : > { %2026 = vmatpush.msk.msra.mxu3 %vm846_vm3, %v949_v26  ;;  %1112 = vmatpush.msra.mxu0 %v1071_v9  ;;  %v1381_v9 = vld [vmem:[#allocation8 + $0x1a8] sm:$0xff] }
 0x137   : > { %978 = vmatpush.msra.mxu2 %v946_v28  ;;  %1136 = vmatpush.msra.mxu1 %v1086_v14  ;;  %v1419_v14 = vld [vmem:[#allocation8 + $0x1f8] sm:$0xff] }
 0x138   : > { %1001 = vmatpush.msra.mxu3 %v947_v32  ;;  %1113 = vmatpush.msra.mxu0 %v1070_v13  ;;  %v1380_v13 = vld [vmem:[#allocation8 + $0x1a0] sm:$0xff] }
 0x139   : > { %979 = vmatpush.msra.mxu2 %v944_v33  ;;  %2043 = vmatpush.msk.msrb.mxu1 %vm846_vm3, %v1265_v19 }
 0x13a   : > { %1002 = vmatpush.msra.mxu3 %v945_v35  ;;  %2041 = vmatpush.msk.msrb.mxu0 %vm846_vm3, %v1225_v17 }
 0x13b   : > { %980 = vmatpush.msra.mxu2 %v942_v36  ;;  %1278 = vmatpush.msrb.mxu1 %v1264_v23  ;;  %v1457_v23 = vld [vmem:[#allocation8 + $0x248] sm:$0xff] }
 0x13c   : > { %1003 = vmatpush.msra.mxu3 %v943_v38  ;;  %2024 = vmatmul.msk.f32.vlgmr.msra.gmra.mxu2 %vm952_vm5, %v950_v37 }
 0x13d   : > { %2027 = vmatmul.msk.f32.vlgmr.msra.gmra.mxu3 %vm952_vm5, %v950_v37  ;;  %2031 = vmatpush.msk.msrb.mxu2 %vm846_vm3, %v948_v24  ;;  %v1303_v24 = vld [vmem:[#allocation8 + $0xf8] sm:$0xff]  ;;  %v1300_v37 = vld [vmem:[#allocation8 + $0xe0] sm:$0xff] }
 0x13e   : > { %2034 = vmatpush.msk.msrb.mxu3 %vm846_vm3, %v949_v26  ;;  %1239 = vmatpush.msrb.mxu0 %v1224_v18  ;;  %v1263_v26 = vld [vmem:[#allocation8 + $0x98] sm:$0xff] }
 0x13f   : > { %1033 = vmatpush.msrb.mxu2 %v946_v28  ;;  %1279 = vmatpush.msrb.mxu1 %v1263_v26  ;;  %v1377_v26 = vld [vmem:[#allocation8 + $0x188] sm:$0xff] }
 0x140   : > { %1056 = vmatpush.msrb.mxu3 %v947_v32  ;;  %1240 = vmatpush.msrb.mxu0 %v1223_v22  ;;  %v1418_v22 = vld [vmem:[#allocation8 + $0x1f0] sm:$0xff] }
 0x141   : > { %1034 = vmatpush.msrb.mxu2 %v944_v33  ;;  %v1301_v33 = vld [vmem:[#allocation8 + $0xe8] sm:$0xff]  ;;  %1280 = vmatpush.msrb.mxu1 %v1262_v31  ;;  %v1416_v31 = vld [vmem:[#allocation8 + $0x1e0] sm:$0xff] }
 0x142   : > { %1057 = vmatpush.msrb.mxu3 %v945_v35  ;;  %v1221_v35 = vld [vmem:[#allocation8 + $0x30] sm:$0xff]  ;;  %1241 = vmatpush.msrb.mxu0 %v1222_v29  ;;  %v1495_v29 = vld [vmem:[#allocation8 + $0x298] sm:$0xff] }
 0x143   : > { %1035 = vmatpush.msrb.mxu2 %v942_v36  ;;  %v1261_v36 = vld [vmem:[#allocation8 + $0x88] sm:$0xff] }
 0x144   : > { %1058 = vmatpush.msrb.mxu3 %v943_v38  ;;  %2025 = vmatmul.msk.f32.gmra.mxu2 %vm952_vm5, %v951_v42  ;;  %v1339_v38 = vld [vmem:[#allocation8 + $0x138] sm:$0xff] }
 0x145   : > { %2028 = vmatmul.msk.f32.gmra.mxu3 %vm952_vm5, %v951_v42  ;;  %1166 = vmatpush.msra.mxu2 %v1160_v43  ;;  %v1338_v42 = vld [vmem:[#allocation8 + $0x130] sm:$0xff]  ;;  %v1219_v43 = vld [vmem:[#allocation8 + $0x20] sm:$0xff] }
 0x146   : > { %1200 = vmatpush.msra.mxu3 %v1165_v0  ;;  %1242 = vmatpush.msrb.mxu0 %v1221_v35  ;;  %v1333_v0 = vld [vmem:[#allocation8 + $0x108] sm:$0xff]  ;;  %v1415_v35 = vld [vmem:[#allocation8 + $0x1d8] sm:$0xff] }
 0x147   : > { %1167 = vmatpush.msra.mxu2 %v1159_v44  ;;  %1281 = vmatpush.msrb.mxu1 %v1261_v36  ;;  %v1259_v44 = vld [vmem:[#allocation8 + $0x78] sm:$0xff]  ;;  %v1454_v36 = vld [vmem:[#allocation8 + $0x230] sm:$0xff] }
 0x148   : > { %1201 = vmatpush.msra.mxu3 %v1164_v4  ;;  %1243 = vmatpush.msrb.mxu0 %v1220_v39  ;;  %v1414_v39 = vld [vmem:[#allocation8 + $0x1d0] sm:$0xff] }
 0x149   : > { %1168 = vmatpush.msra.mxu2 %v1158_v45  ;;  %1282 = vmatpush.msrb.mxu1 %v1260_v40  ;;  %v1298_v45 = vld [vmem:[#allocation8 + $0xd0] sm:$0xff]  ;;  %v1453_v40 = vld [vmem:[#allocation8 + $0x228] sm:$0xff] }
 0x14a   : > { %1202 = vmatpush.msra.mxu3 %v1163_v8  ;;  %1244 = vmatpush.msrb.mxu0 %v1219_v43  ;;  %v1499_v8 = vld [vmem:[#allocation8 + $0x2b8] sm:$0xf]  ;;  %v1413_v43 = vld [vmem:[#allocation8 + $0x1c8] sm:$0xff] }
 0x14b   : > { %1169 = vmatpush.msra.mxu2 %v1157_v46  ;;  %v1337_v46 = vld [vmem:[#allocation8 + $0x128] sm:$0xff]  ;;  %1283 = vmatpush.msrb.mxu1 %v1259_v44  ;;  %v1452_v44 = vld [vmem:[#allocation8 + $0x220] sm:$0xff] }
 0x14c   : > { %2032 = vmatmul.msk.f32.vlgmr.msrb.gmra.mxu2 %vm952_vm5, %v2029_v47  ;;  %1203 = vmatpush.msra.mxu3 %v1162_v12  ;;  %v1498_v12 = vld [vmem:[#allocation8 + $0x2b0] sm:$0xff] }
 0x14d   : > { %2035 = vmatmul.msk.f32.vlgmr.msrb.gmra.mxu3 %vm952_vm5, %v2029_v47  ;;  %1170 = vmatpush.msra.mxu2 %v1156_v48  ;;  %v1218_v48 = vld [vmem:[#allocation8 + $0x18] sm:$0xff] }
 0x14e   : > { %1204 = vmatpush.msra.mxu3 %v1161_v16  ;;  %1245 = vmatpush.msrb.mxu0 %v1218_v48  ;;  %v1497_v16 = vld [vmem:[#allocation8 + $0x2a8] sm:$0xff]  ;;  %v1451_v48 = vld [vmem:[#allocation8 + $0x218] sm:$0xff] }
 0x14f   : > { %1171 = vmatpush.msra.mxu2 %v1155_v49  ;;  %v1258_v49 = vld [vmem:[#allocation8 + $0x70] sm:$0xff] }
 0x150   : > { %2045 = vmatpush.msk.msrb.mxu3 %vm846_vm3, %v1304_v20  ;;  %1284 = vmatpush.msrb.mxu1 %v1258_v49  ;;  %v1490_v49 = vld [vmem:[#allocation8 + $0x270] sm:$0xff] }
 0x151   : > { %1172 = vmatpush.msra.mxu2 %v1154_v52  ;;  %v1336_v52 = vld [vmem:[#allocation8 + $0x120] sm:$0xff]  ;;  %1246 = vmatpush.msrb.mxu0 %v1217_v53 }
 0x152   : > { %1317 = vmatpush.msrb.mxu3 %v1303_v24  ;;  %v1496_v24 = vld [vmem:[#allocation8 + $0x2a0] sm:$0xff] }
 0x153   : > { %1173 = vmatpush.msra.mxu2 %v1153_v54  ;;  %v1257_v54 = vld [vmem:[#allocation8 + $0x68] sm:$0xff]  ;;  %1247 = vmatpush.msrb.mxu0 %v1216_v57 }
 0x154   : > { %2033 = vmatmul.msk.f32.gmra.mxu2 %vm952_vm5, %v2030_v50  ;;  %1318 = vmatpush.msrb.mxu3 %v1302_v27  ;;  %v1417_v27 = vld [vmem:[#allocation8 + $0x1e8] sm:$0xff] }
 0x155   : > { %2036 = vmatmul.msk.f32.gmra.mxu3 %vm952_vm5, %v2030_v50  ;;  %1174 = vmatpush.msra.mxu2 %v1152_v56  ;;  %v1335_v56 = vld [vmem:[#allocation8 + $0x118] sm:$0xff] }
 0x156   : > { %1319 = vmatpush.msrb.mxu3 %v1301_v33  ;;  %1285 = vmatpush.msrb.mxu1 %v1257_v54  ;;  %v1494_v33 = vld [vmem:[#allocation8 + $0x290] sm:$0xff] }
 0x157   : > { %1175 = vmatpush.msra.mxu2 %v1151_v58  ;;  %v1256_v58 = vld [vmem:[#allocation8 + $0x60] sm:$0xff]  ;;  %1248 = vmatpush.msrb.mxu0 %v1215_v61 }
 0x158   : > { %1320 = vmatpush.msrb.mxu3 %v1300_v37  ;;  %1286 = vmatpush.msrb.mxu1 %v1256_v58  ;;  %v1493_v37 = vld [vmem:[#allocation8 + $0x288] sm:$0xff] }
 0x159   : > { %1176 = vmatpush.msra.mxu2 %v1150_v60  ;;  %v1334_v60 = vld [vmem:[#allocation8 + $0x110] sm:$0xff] }
 0x15a   : > { %1321 = vmatpush.msrb.mxu3 %v1299_v41  ;;  %1287 = vmatpush.msrb.mxu1 %v1255_v62  ;;  %v1492_v41 = vld [vmem:[#allocation8 + $0x280] sm:$0xff] }
 0x15b   : > { %1177 = vmatpush.msra.mxu2 %v1149_v63  ;;  %v1294_v63 = vld [vmem:[#allocation8 + $0xb0] sm:$0xff] }
 0x15c   : > { %1322 = vmatpush.msrb.mxu3 %v1298_v45  ;;  %v1491_v45 = vld [vmem:[#allocation8 + $0x278] sm:$0xff] }
 0x15d   : > { %1178 = vmatpush.msra.mxu2 %v1148_v3 }
 0x15e   : > { %1323 = vmatpush.msrb.mxu3 %v1297_v51  ;;  %v1450_v51 = vld [vmem:[#allocation8 + $0x210] sm:$0xff] }
 0x15f   : > { %1179 = vmatpush.msra.mxu2 %v1147_v7  ;;  %v1460_v7 = vld [vmem:[#allocation8 + $0x260] sm:$0xf] }
 0x160   : > { %1324 = vmatpush.msrb.mxu3 %v1296_v55 }
 0x161   : > { %1180 = vmatpush.msra.mxu2 %v1146_v11  ;;  %v1459_v11 = vld [vmem:[#allocation8 + $0x258] sm:$0xff] }
 0x162   : > { %1325 = vmatpush.msrb.mxu3 %v1295_v59 }
 0x163   : > { %1181 = vmatpush.msra.mxu2 %v1145_v15  ;;  %v1458_v15 = vld [vmem:[#allocation8 + $0x250] sm:$0xff] }
 0x164   : > { %1326 = vmatpush.msrb.mxu3 %v1294_v63 }
 0x165   : > { %2047 = vmatpush.msk.msrb.mxu2 %vm846_vm3, %v1343_v21  ;;  %v1379_v21 = vld [vmem:[#allocation8 + $0x198] sm:$0xff] }
 0x167   : > { %1356 = vmatpush.msrb.mxu2 %v1342_v25  ;;  %v1378_v25 = vld [vmem:[#allocation8 + $0x190] sm:$0xff] }
 0x169   : > { %1357 = vmatpush.msrb.mxu2 %v1341_v30  ;;  %v1376_v30 = vld [vmem:[#allocation8 + $0x180] sm:$0xff] }
 0x16b   : > { %1358 = vmatpush.msrb.mxu2 %v1340_v34  ;;  %v1375_v34 = vld [vmem:[#allocation8 + $0x178] sm:$0xff] }
 0x16d   : > { %1359 = vmatpush.msrb.mxu2 %v1339_v38  ;;  %v1374_v38 = vld [vmem:[#allocation8 + $0x170] sm:$0xff] }
 0x16f   : > { %1360 = vmatpush.msrb.mxu2 %v1338_v42  ;;  %v1373_v42 = vld [vmem:[#allocation8 + $0x168] sm:$0xff] }
 0x171   : > { %1361 = vmatpush.msrb.mxu2 %v1337_v46  ;;  %v1372_v46 = vld [vmem:[#allocation8 + $0x160] sm:$0xff] }
 0x173   : > { %1362 = vmatpush.msrb.mxu2 %v1336_v52  ;;  %v1489_v52 = vld [vmem:[#allocation8 + $0x268] sm:$0xff] }
 0x175   : > { %1363 = vmatpush.msrb.mxu2 %v1335_v56 }
 0x177   : > { %1364 = vmatpush.msrb.mxu2 %v1334_v60  ;;  %v1538_v60 = vld [vmem:[#allocation8 + $0x310] sm:$0xf] }
 0x179   : > { %1365 = vmatpush.msrb.mxu2 %v1333_v0  ;;  %v1537_v0 = vld [vmem:[#allocation8 + $0x308] sm:$0xff] }
 0x1bf   : > { %v2783_v28 = vpop.f32.mrf.mxu2 }
 0x1c0   : > { %v2785_v32 = vpop.f32.mrf.mxu3 }
 0x1c7   : > { %v2787_v47 = vpop.f32.mrf.mxu2 }
 0x1c8   : > { %v2789_v50 = vpop.f32.mrf.mxu3 }
 0x1cf   : > { %v1037_v1 = vpop.f32.mrf.mxu2 }
 0x1d0   : > { %v1066_v2 = vmax.f32 %v2783_v28, %v1037_v1  ;;  %v1060_v3 = vpop.f32.mrf.mxu3  ;;  %v1456_v28 = vld [vmem:[#allocation8 + $0x240] sm:$0xff]  ;;  %v1577_v1 = vld [vmem:[#allocation8 + $0x368] sm:$0xf] }
 0x1d1   : > { %v1067_v4 = vmax.f32 %v2785_v32, %v1060_v3  ;;  %v1455_v32 = vld [vmem:[#allocation8 + $0x238] sm:$0xff] }
 0x1d2   : > { %1114 = vmatmul.f32.vlgmr.msra.gmra.mxu0 %v1066_v2  ;;  %1182 = vmatmul.f32.vlgmr.msra.gmra.mxu2 %v1066_v2  ;;  %v1616_v2 = vld [vmem:[#allocation8 + $0x3c0] sm:$0xf]  ;;  %v1655_v3 = vld [vmem:[#allocation8 + $0x418] sm:$0xf] }
 0x1d3   : > { %2037 = vmatmul.msk.f32.vlgmr.msra.gmra.mxu1 %vm1091_vm6, %v1067_v4  ;;  %2039 = vmatmul.msk.f32.vlgmr.msra.gmra.mxu3 %vm1091_vm6, %v1067_v4  ;;  %v1536_v4 = vld [vmem:[#allocation8 + $0x300] sm:$0xff] }
 0x1d4   : > { %2049 = vmatpush.msk.msra.mxu0 %vm846_vm3, %v1382_v5  ;;  %2051 = vmatpush.msk.msra.mxu1 %vm846_vm3, %v1421_v6  ;;  %v1576_v5 = vld [vmem:[#allocation8 + $0x360] sm:$0xff]  ;;  %v1615_v6 = vld [vmem:[#allocation8 + $0x3b8] sm:$0xff] }
 0x1d5   : > { %2053 = vmatpush.msk.msra.mxu3 %vm846_vm3, %v1460_v7  ;;  %2055 = vmatpush.msk.msra.mxu2 %vm846_vm3, %v1499_v8  ;;  %v1654_v7 = vld [vmem:[#allocation8 + $0x410] sm:$0xff]  ;;  %v1535_v8 = vld [vmem:[#allocation8 + $0x2f8] sm:$0xff] }
 0x1d6   : > { %1395 = vmatpush.msra.mxu0 %v1381_v9  ;;  %1434 = vmatpush.msra.mxu1 %v1420_v10  ;;  %v1575_v9 = vld [vmem:[#allocation8 + $0x358] sm:$0xff]  ;;  %v1614_v10 = vld [vmem:[#allocation8 + $0x3b0] sm:$0xff] }
 0x1d7   : > { %v1040_v17 = vpop.f32.mrf.mxu2  ;;  %1473 = vmatpush.msra.mxu3 %v1459_v11  ;;  %1512 = vmatpush.msra.mxu2 %v1498_v12  ;;  %v1653_v11 = vld [vmem:[#allocation8 + $0x408] sm:$0xff] }
 0x1d8   : > { %v1068_v18 = vmax.f32 %v2787_v47, %v1040_v17  ;;  %v1063_v19 = vpop.f32.mrf.mxu3  ;;  %1396 = vmatpush.msra.mxu0 %v1380_v13  ;;  %1435 = vmatpush.msra.mxu1 %v1419_v14  ;;  %v1412_v47 = vld [vmem:[#allocation8 + $0x1c0] sm:$0xff]  ;;  %v1534_v13 = vld [vmem:[#allocation8 + $0x2f0] sm:$0xff] }
 0x1d9   : > { %v1069_v20 = vmax.f32 %v2789_v50, %v1063_v19  ;;  %1474 = vmatpush.msra.mxu3 %v1458_v15  ;;  %1513 = vmatpush.msra.mxu2 %v1497_v16  ;;  %v1411_v50 = vld [vmem:[#allocation8 + $0x1b8] sm:$0xff]  ;;  %v1574_v14 = vld [vmem:[#allocation8 + $0x350] sm:$0xff]  ;;  %v1613_v15 = vld [vmem:[#allocation8 + $0x3a8] sm:$0xff] }
 0x1da   : > { %1117 = vmatmul.f32.gmra.mxu0 %v1068_v18  ;;  %1185 = vmatmul.f32.gmra.mxu2 %v1068_v18  ;;  %v1652_v16 = vld [vmem:[#allocation8 + $0x400] sm:$0xff]  ;;  %v1533_v19 = vld [vmem:[#allocation8 + $0x2e8] sm:$0xff] }
 0x1db   : > { %2038 = vmatmul.msk.f32.gmra.mxu1 %vm1091_vm6, %v1069_v20  ;;  %2040 = vmatmul.msk.f32.gmra.mxu3 %vm1091_vm6, %v1069_v20 }
 0x1dc   : > { %1397 = vmatpush.msra.mxu0 %v1379_v21  ;;  %1436 = vmatpush.msra.mxu1 %v1418_v22  ;;  %v1573_v21 = vld [vmem:[#allocation8 + $0x348] sm:$0xff]  ;;  %v1612_v22 = vld [vmem:[#allocation8 + $0x3a0] sm:$0xff] }
 0x1dd   : > { %1475 = vmatpush.msra.mxu3 %v1457_v23  ;;  %1514 = vmatpush.msra.mxu2 %v1496_v24  ;;  %v1651_v23 = vld [vmem:[#allocation8 + $0x3f8] sm:$0xff]  ;;  %v1532_v24 = vld [vmem:[#allocation8 + $0x2e0] sm:$0xff] }
 0x1de   : > { %1398 = vmatpush.msra.mxu0 %v1378_v25  ;;  %1437 = vmatpush.msra.mxu1 %v1417_v27  ;;  %v1572_v25 = vld [vmem:[#allocation8 + $0x340] sm:$0xff]  ;;  %v1650_v27 = vld [vmem:[#allocation8 + $0x3f0] sm:$0xff] }
 0x1df   : > { %1476 = vmatpush.msra.mxu3 %v1456_v28  ;;  %1515 = vmatpush.msra.mxu2 %v1495_v29  ;;  %v1531_v28 = vld [vmem:[#allocation8 + $0x2d8] sm:$0xff] }
 0x1e0   : > { %1399 = vmatpush.msra.mxu0 %v1377_v26  ;;  %1438 = vmatpush.msra.mxu1 %v1416_v31  ;;  %v1611_v26 = vld [vmem:[#allocation8 + $0x398] sm:$0xff] }
 0x1e1   : > { %1477 = vmatpush.msra.mxu3 %v1455_v32  ;;  %1516 = vmatpush.msra.mxu2 %v1494_v33  ;;  %v1571_v31 = vld [vmem:[#allocation8 + $0x338] sm:$0xff]  ;;  %v1610_v32 = vld [vmem:[#allocation8 + $0x390] sm:$0xff]  ;;  %v1649_v33 = vld [vmem:[#allocation8 + $0x3e8] sm:$0xff] }
 0x1e2   : > { %1400 = vmatpush.msra.mxu0 %v1376_v30  ;;  %1439 = vmatpush.msra.mxu1 %v1415_v35 }
 0x1e3   : > { %1478 = vmatpush.msra.mxu3 %v1454_v36  ;;  %1517 = vmatpush.msra.mxu2 %v1493_v37  ;;  %v1570_v37 = vld [vmem:[#allocation8 + $0x330] sm:$0xff] }
 0x1e4   : > { %1401 = vmatpush.msra.mxu0 %v1375_v34  ;;  %1440 = vmatpush.msra.mxu1 %v1414_v39  ;;  %v1530_v34 = vld [vmem:[#allocation8 + $0x2d0] sm:$0xff] }
 0x1e5   : > { %1479 = vmatpush.msra.mxu3 %v1453_v40  ;;  %1518 = vmatpush.msra.mxu2 %v1492_v41  ;;  %v1648_v40 = vld [vmem:[#allocation8 + $0x3e0] sm:$0xff]  ;;  %v1529_v41 = vld [vmem:[#allocation8 + $0x2c8] sm:$0xff] }
 0x1e6   : > { %1402 = vmatpush.msra.mxu0 %v1374_v38  ;;  %1441 = vmatpush.msra.mxu1 %v1413_v43  ;;  %v1609_v38 = vld [vmem:[#allocation8 + $0x388] sm:$0xff]  ;;  %v1608_v43 = vld [vmem:[#allocation8 + $0x380] sm:$0xff] }
 0x1e7   : > { %1480 = vmatpush.msra.mxu3 %v1452_v44  ;;  %1519 = vmatpush.msra.mxu2 %v1491_v45  ;;  %v1647_v45 = vld [vmem:[#allocation8 + $0x3d8] sm:$0xff] }
 0x1e8   : > { %1403 = vmatpush.msra.mxu0 %v1373_v42  ;;  %1442 = vmatpush.msra.mxu1 %v1412_v47  ;;  %v1569_v42 = vld [vmem:[#allocation8 + $0x328] sm:$0xff]  ;;  %v1568_v47 = vld [vmem:[#allocation8 + $0x320] sm:$0xff] }
 0x1e9   : > { %1481 = vmatpush.msra.mxu3 %v1451_v48  ;;  %1520 = vmatpush.msra.mxu2 %v1490_v49  ;;  %v1607_v48 = vld [vmem:[#allocation8 + $0x378] sm:$0xff] }
 0x1ea   : > { %1404 = vmatpush.msra.mxu0 %v1372_v46  ;;  %1443 = vmatpush.msra.mxu1 %v1411_v50  ;;  %v1528_v46 = vld [vmem:[#allocation8 + $0x2c0] sm:$0xff]  ;;  %v1646_v50 = vld [vmem:[#allocation8 + $0x3d0] sm:$0xff] }
 0x1eb   : > { %1482 = vmatpush.msra.mxu3 %v1450_v51  ;;  %1521 = vmatpush.msra.mxu2 %v1489_v52  ;;  %v1694_v51 = vld [vmem:[#allocation8 + $0x470] sm:$0xf]  ;;  %v1567_v52 = vld [vmem:[#allocation8 + $0x318] sm:$0xff] }
 0x24f   : > { %v1115_v53 = vpop.f32.mrf.mxu0 }
 0x250   : > { %v1138_v54 = vpop.f32.mrf.mxu1 }
 0x251   : > { %v1139_v57 = vadd.f32 %v1138_v54, %v1115_v53  ;;  %v1606_v53 = vld [vmem:[#allocation8 + $0x370] sm:$0xff]  ;;  %v1645_v54 = vld [vmem:[#allocation8 + $0x3c8] sm:$0xff] }
 0x255   : > { %v1183_v55 = vpop.f32.mrf.mxu2 }
 0x256   : > { %v1206_v56 = vpop.f32.mrf.mxu3 }
 0x257   : > { %v1207_v58 = vadd.f32 %v1206_v56, %v1183_v55  ;;  %v1118_v35 = vpop.f32.mrf.mxu0 }
 0x258   : > { %v1141_v36 = vpop.f32.mrf.mxu1 }
 0x259   : > { %v1212_v59 = vmax.f32 %v1139_v57, %v1207_v58  ;;  %v1142_v44 = vadd.f32 %v1141_v36, %v1118_v35  ;;  %v1693_v57 = vld [vmem:[#allocation8 + $0x468] sm:$0xff] }
 0x25b   : > { %2042 = vmatmul.msk.f32.vlgmr.msrb.gmra.mxu0 %vm1226_vm7, %v1212_v59  ;;  %v1266_v61 = vrot.slane %v1212_v59, 1  ;;  %v1305_v62 = vrot.slane %v1212_v59, 2  ;;  %v1344_v63 = vrot.slane %v1212_v59, 3  ;;  %v1383_v12 = vrot.slane %v1212_v59, 4 }
 0x25c   : > { %2057 = vmatpush.msk.msrb.mxu0 %vm846_vm3, %v1538_v60  ;;  %v1422_v17 = vrot.slane %v1212_v59, 5  ;;  %v1461_v18 = vrot.slane %v1212_v59, 6  ;;  %v1500_v20 = vrot.slane %v1212_v59, 7  ;;  %v1733_v59 = vld [vmem:[#allocation8 + $0x4c8] sm:$0xf]  ;;  %v1692_v60 = vld [vmem:[#allocation8 + $0x460] sm:$0xff] }
 0x25d   : > { %2044 = vmatmul.msk.f32.vlgmr.msrb.gmra.mxu1 %vm1226_vm7, %v1266_v61  ;;  %2046 = vmatmul.msk.f32.vlgmr.msrb.gmra.mxu3 %vm1226_vm7, %v1305_v62  ;;  %v1186_v29 = vpop.f32.mrf.mxu2  ;;  %v1732_v61 = vld [vmem:[#allocation8 + $0x4c0] sm:$0xff]  ;;  %v1691_v62 = vld [vmem:[#allocation8 + $0x458] sm:$0xff] }
 0x25e   : > { %2048 = vmatmul.msk.f32.vlgmr.msrb.gmra.mxu2 %vm1226_vm7, %v1344_v63  ;;  %1551 = vmatpush.msrb.mxu0 %v1537_v0  ;;  %v1209_v30 = vpop.f32.mrf.mxu3  ;;  %v1731_v63 = vld [vmem:[#allocation8 + $0x4b8] sm:$0xff]  ;;  %v1690_v0 = vld [vmem:[#allocation8 + $0x450] sm:$0xff] }
 0x25f   : > { %2059 = vmatpush.msk.msrb.mxu1 %vm846_vm3, %v1577_v1  ;;  %2061 = vmatpush.msk.msrb.mxu3 %vm846_vm3, %v1616_v2  ;;  %v1210_v39 = vadd.f32 %v1209_v30, %v1186_v29  ;;  %v1730_v1 = vld [vmem:[#allocation8 + $0x4b0] sm:$0xff]  ;;  %v1689_v2 = vld [vmem:[#allocation8 + $0x448] sm:$0xff]  ;;  %v1768_v30 = vld [vmem:[#allocation10 + $0x30] sm:$0xff] }
 0x260   : > { %2063 = vmatpush.msk.msrb.mxu2 %vm846_vm3, %v1655_v3  ;;  %1552 = vmatpush.msrb.mxu0 %v1536_v4  ;;  %v1729_v3 = vld [vmem:[#allocation8 + $0x4a8] sm:$0xff]  ;;  %v1688_v4 = vld [vmem:[#allocation8 + $0x440] sm:$0xff] }
 0x261   : > { %1590 = vmatpush.msrb.mxu1 %v1576_v5  ;;  %1629 = vmatpush.msrb.mxu3 %v1615_v6  ;;  %v2815_v49 = vmax.f32 %v1142_v44, %v1210_v39  ;;  %v1728_v5 = vld [vmem:[#allocation8 + $0x4a0] sm:$0xff]  ;;  %v1687_v6 = vld [vmem:[#allocation8 + $0x438] sm:$0xff] }
 0x262   : > { %1668 = vmatpush.msrb.mxu2 %v1654_v7  ;;  %1553 = vmatpush.msrb.mxu0 %v1535_v8  ;;  %v1727_v7 = vld [vmem:[#allocation8 + $0x498] sm:$0xff]  ;;  %v1686_v8 = vld [vmem:[#allocation8 + $0x430] sm:$0xff]  ;;  %v1764_v39 = vld [vmem:[#allocation10 + $0x10] sm:$0xff] }
 0x263   : > { %1591 = vmatpush.msrb.mxu1 %v1575_v9  ;;  %1630 = vmatpush.msrb.mxu3 %v1614_v10  ;;  %v1578_v55 = vrot.slane %v2815_v49, 1  ;;  %v1617_v56 = vrot.slane %v2815_v49, 2  ;;  %v1656_v58 = vrot.slane %v2815_v49, 3  ;;  %v1726_v9 = vld [vmem:[#allocation8 + $0x490] sm:$0xff]  ;;  %v1685_v10 = vld [vmem:[#allocation8 + $0x428] sm:$0xff] }
 0x264   : > { %1669 = vmatpush.msrb.mxu2 %v1653_v11  ;;  %2050 = vmatmul.msk.f32.vlgmr.msra.gmra.mxu0 %vm1226_vm7, %v1383_v12  ;;  %v1725_v11 = vld [vmem:[#allocation8 + $0x488] sm:$0xff]  ;;  %v1684_v12 = vld [vmem:[#allocation8 + $0x420] sm:$0xff] }
 0x265   : > { %1554 = vmatpush.msrb.mxu0 %v1534_v13  ;;  %1592 = vmatpush.msrb.mxu1 %v1574_v14  ;;  %v1724_v13 = vld [vmem:[#allocation8 + $0x480] sm:$0xff]  ;;  %v1695_v14 = vrot.slane %v2815_v49, 4 }
 0x266   : > { %1631 = vmatpush.msrb.mxu3 %v1613_v15  ;;  %1670 = vmatpush.msrb.mxu2 %v1652_v16  ;;  %v1723_v15 = vld [vmem:[#allocation8 + $0x478] sm:$0xff]  ;;  %v1734_v16 = vrot.slane %v2815_v49, 5 }
 0x267   : > { %2052 = vmatmul.msk.f32.vlgmr.msra.gmra.mxu1 %vm1226_vm7, %v1422_v17  ;;  %2054 = vmatmul.msk.f32.vlgmr.msra.gmra.mxu3 %vm1226_vm7, %v1461_v18  ;;  %v1777_v17 = vld [vmem:[#allocation10 + $0x78] sm:$0xff]  ;;  %v1776_v18 = vld [vmem:[#allocation10 + $0x70] sm:$0xff] }
 0x268   : > { %2056 = vmatmul.msk.f32.vlgmr.msra.gmra.mxu2 %vm1226_vm7, %v1500_v20  ;;  %1555 = vmatpush.msrb.mxu0 %v1533_v19  ;;  %v1775_v19 = vld [vmem:[#allocation10 + $0x68] sm:$0xff]  ;;  %v1774_v20 = vld [vmem:[#allocation10 + $0x60] sm:$0xff] }
 0x269   : > { %1593 = vmatpush.msrb.mxu1 %v1573_v21  ;;  %1632 = vmatpush.msrb.mxu3 %v1612_v22  ;;  %v1773_v21 = vld [vmem:[#allocation10 + $0x58] sm:$0xff]  ;;  %v1772_v22 = vld [vmem:[#allocation10 + $0x50] sm:$0xff] }
 0x26a   : > { %1671 = vmatpush.msrb.mxu2 %v1651_v23  ;;  %1556 = vmatpush.msrb.mxu0 %v1532_v24  ;;  %v1214_v23 = vld [vmem:[%s2880_s6] sm:$0x1] }
 0x26b   : > { %1594 = vmatpush.msrb.mxu1 %v1572_v25  ;;  %1633 = vmatpush.msrb.mxu3 %v1611_v26  ;;  %v1771_v25 = vld [vmem:[#allocation10 + $0x48] sm:$0xff]  ;;  %v1770_v26 = vld [vmem:[#allocation10 + $0x40] sm:$0xff] }
 0x26c   : > { %1672 = vmatpush.msrb.mxu2 %v1650_v27  ;;  %1557 = vmatpush.msrb.mxu0 %v1531_v28  ;;  %v1769_v27 = vld [vmem:[#allocation10 + $0x38] sm:$0xff] }
 0x26d   : > { %1595 = vmatpush.msrb.mxu1 %v1571_v31  ;;  %1634 = vmatpush.msrb.mxu3 %v1610_v32  ;;  %v1767_v32 = vld [vmem:[#allocation10 + $0x28] sm:$0xff] }
 0x26e   : > { %1673 = vmatpush.msrb.mxu2 %v1649_v33  ;;  %1558 = vmatpush.msrb.mxu0 %v1530_v34  ;;  %v1766_v34 = vld [vmem:[#allocation10 + $0x20] sm:$0xff] }
 0x26f   : > { %1596 = vmatpush.msrb.mxu1 %v1570_v37  ;;  %1635 = vmatpush.msrb.mxu3 %v1609_v38  ;;  %v1765_v37 = vld [vmem:[#allocation10 + $0x18] sm:$0xff] }
 0x270   : > { %1674 = vmatpush.msrb.mxu2 %v1648_v40  ;;  %1559 = vmatpush.msrb.mxu0 %v1529_v41  ;;  %v1763_v41 = vld [vmem:[#allocation10 + $0x8] sm:$0xff] }
 0x271   : > { %1597 = vmatpush.msrb.mxu1 %v1569_v42  ;;  %1636 = vmatpush.msrb.mxu3 %v1608_v43  ;;  %v1762_v43 = vld [vmem:[#allocation10] sm:$0xff] }
 0x272   : > { %1675 = vmatpush.msrb.mxu2 %v1647_v45  ;;  %1560 = vmatpush.msrb.mxu0 %v1528_v46  ;;  %v1815_v45 = vld [vmem:[#allocation11 + $0x78] sm:$0xff]  ;;  %v1814_v46 = vld [vmem:[#allocation11 + $0x70] sm:$0xff] }
 0x273   : > { %1598 = vmatpush.msrb.mxu1 %v1568_v47  ;;  %1637 = vmatpush.msrb.mxu3 %v1607_v48 }
 0x274   : > { %1676 = vmatpush.msrb.mxu2 %v1646_v50  ;;  %2058 = vmatmul.msk.f32.vlgmr.msrb.gmra.mxu0 %vm1226_vm7, %v2815_v49  ;;  %v1813_v49 = vld [vmem:[#allocation11 + $0x68] sm:$0xff]  ;;  %v1812_v50 = vld [vmem:[#allocation11 + $0x60] sm:$0xff] }
 0x275   : > { %2065 = vmatpush.msk.msra.mxu0 %vm846_vm3, %v1694_v51  ;;  %1599 = vmatpush.msrb.mxu1 %v1567_v52  ;;  %v1811_v52 = vld [vmem:[#allocation11 + $0x58] sm:$0xff] }
 0x276   : > { %1638 = vmatpush.msrb.mxu3 %v1606_v53  ;;  %1677 = vmatpush.msrb.mxu2 %v1645_v54  ;;  %v1810_v54 = vld [vmem:[#allocation11 + $0x50] sm:$0xff] }
 0x277   : > { %2060 = vmatmul.msk.f32.vlgmr.msrb.gmra.mxu1 %vm1226_vm7, %v1578_v55  ;;  %2062 = vmatmul.msk.f32.vlgmr.msrb.gmra.mxu3 %vm1226_vm7, %v1617_v56 }
 0x278   : > { %2064 = vmatmul.msk.f32.vlgmr.msrb.gmra.mxu2 %vm1226_vm7, %v1656_v58  ;;  %1707 = vmatpush.msra.mxu0 %v1693_v57  ;;  %v1809_v57 = vld [vmem:[#allocation11 + $0x48] sm:$0xff]  ;;  %v1808_v58 = vld [vmem:[#allocation11 + $0x40] sm:$0xff] }
 0x279   : > { %2067 = vmatpush.msk.msra.mxu1 %vm846_vm3, %v1733_v59  ;;  %1779 = vmatpush.msra.mxu3 %v1777_v17 }
 0x27a   : > { %1708 = vmatpush.msra.mxu0 %v1692_v60  ;;  %1817 = vmatpush.msra.mxu2 %v1815_v45 }
 0x27b   : > { %1746 = vmatpush.msra.mxu1 %v1732_v61  ;;  %1780 = vmatpush.msra.mxu3 %v1776_v18  ;;  %v1807_v61 = vld [vmem:[#allocation11 + $0x38] sm:$0xff] }
 0x27c   : > { %1709 = vmatpush.msra.mxu0 %v1691_v62  ;;  %1818 = vmatpush.msra.mxu2 %v1814_v46 }
 0x27d   : > { %1747 = vmatpush.msra.mxu1 %v1731_v63  ;;  %1781 = vmatpush.msra.mxu3 %v1775_v19  ;;  %v1806_v63 = vld [vmem:[#allocation11 + $0x30] sm:$0xff]  ;;  %v1816_v19 = vld [vmem:[%s2884_s10] sm:$0x1] }
 0x27e   : > { %1710 = vmatpush.msra.mxu0 %v1690_v0  ;;  %1819 = vmatpush.msra.mxu2 %v1813_v49 }
 0x27f   : > { %1748 = vmatpush.msra.mxu1 %v1730_v1  ;;  %1782 = vmatpush.msra.mxu3 %v1774_v20  ;;  %v1805_v1 = vld [vmem:[#allocation11 + $0x28] sm:$0xff] }
 0x280   : > { %1711 = vmatpush.msra.mxu0 %v1689_v2  ;;  %1820 = vmatpush.msra.mxu2 %v1812_v50 }
 0x281   : > { %1749 = vmatpush.msra.mxu1 %v1729_v3  ;;  %1783 = vmatpush.msra.mxu3 %v1773_v21  ;;  %v1804_v3 = vld [vmem:[#allocation11 + $0x20] sm:$0xff] }
 0x282   : > { %1712 = vmatpush.msra.mxu0 %v1688_v4  ;;  %1821 = vmatpush.msra.mxu2 %v1811_v52 }
 0x283   : > { %1750 = vmatpush.msra.mxu1 %v1728_v5  ;;  %1784 = vmatpush.msra.mxu3 %v1772_v22  ;;  %v1803_v5 = vld [vmem:[#allocation11 + $0x18] sm:$0xff] }
 0x284   : > { %1713 = vmatpush.msra.mxu0 %v1687_v6  ;;  %1822 = vmatpush.msra.mxu2 %v1810_v54 }
 0x285   : > { %1751 = vmatpush.msra.mxu1 %v1727_v7  ;;  %1785 = vmatpush.msra.mxu3 %v1771_v25 }
 0x286   : > { %1714 = vmatpush.msra.mxu0 %v1686_v8  ;;  %1823 = vmatpush.msra.mxu2 %v1809_v57 }
 0x287   : > { %1752 = vmatpush.msra.mxu1 %v1726_v9  ;;  %1786 = vmatpush.msra.mxu3 %v1770_v26 }
 0x288   : > { %1715 = vmatpush.msra.mxu0 %v1685_v10  ;;  %1824 = vmatpush.msra.mxu2 %v1808_v58 }
 0x289   : > { %1753 = vmatpush.msra.mxu1 %v1725_v11  ;;  %1787 = vmatpush.msra.mxu3 %v1769_v27 }
 0x28a   : > { %1716 = vmatpush.msra.mxu0 %v1684_v12  ;;  %1825 = vmatpush.msra.mxu2 %v1807_v61  ;;  %v1802_v12 = vld [vmem:[#allocation11 + $0x10] sm:$0xff] }
 0x28b   : > { %1754 = vmatpush.msra.mxu1 %v1724_v13  ;;  %2066 = vmatmul.msk.f32.vlgmr.msra.gmra.mxu0 %vm1226_vm7, %v1695_v14  ;;  %v1801_v13 = vld [vmem:[#allocation11 + $0x8] sm:$0xff]  ;;  %v1800_v14 = vld [vmem:[#allocation11] sm:$0xff] }
 0x28c   : > { %1788 = vmatpush.msra.mxu3 %v1768_v30  ;;  %1826 = vmatpush.msra.mxu2 %v1806_v63 }
 0x28d   : > { %1755 = vmatpush.msra.mxu1 %v1723_v15  ;;  %v1778_v15 = vld [vmem:[%s2882_s8] sm:$0x1] }
 0x28e   : > { %2068 = vmatmul.msk.f32.vlgmr.msra.gmra.mxu1 %vm1226_vm7, %v1734_v16  ;;  %1789 = vmatpush.msra.mxu3 %v1767_v32 }
 0x28f   : > { %1827 = vmatpush.msra.mxu2 %v1805_v1 }
 0x290   : > { %1790 = vmatpush.msra.mxu3 %v1766_v34 }
 0x291   : > { %1828 = vmatpush.msra.mxu2 %v1804_v3 }
 0x292   : > { %1791 = vmatpush.msra.mxu3 %v1765_v37 }
 0x293   : > { %1829 = vmatpush.msra.mxu2 %v1803_v5 }
 0x294   : > { %1792 = vmatpush.msra.mxu3 %v1764_v39 }
 0x295   : > { %1830 = vmatpush.msra.mxu2 %v1802_v12 }
 0x296   : > { %1793 = vmatpush.msra.mxu3 %v1763_v41 }
 0x297   : > { %1831 = vmatpush.msra.mxu2 %v1801_v13 }
 0x298   : > { %1794 = vmatpush.msra.mxu3 %v1762_v43 }
 0x299   : > { %1832 = vmatpush.msra.mxu2 %v1800_v14 }
 0x2d8   : > { %v1250_v24 = vpop.f32.mrf.mxu0 }
 0x2d9   : > { %v1253_v28 = vadd.f32 %v1250_v24, %v1214_v23 }
 0x2da   : > { %v1289_v29 = vpop.f32.mrf.mxu1 }
 0x2db   : > { %v1292_v33 = vadd.f32 %v1289_v29, %v1253_v28 }
 0x2e0   : > { %v1328_v31 = vpop.f32.mrf.mxu3 }
 0x2e1   : > { %v1331_v35 = vadd.f32 %v1328_v31, %v1292_v33  ;;  %v1367_v36 = vpop.f32.mrf.mxu2  ;;  %v1406_v40 = vpop.f32.mrf.mxu0 }
 0x2e3   : > { %v1370_v38 = vadd.f32 %v1367_v36, %v1331_v35 }
 0x2e4   : > { %v1445_v44 = vpop.f32.mrf.mxu1 }
 0x2e5   : > { %v1409_v42 = vadd.f32 %v1406_v40, %v1370_v38 }
 0x2e7   : > { %v1448_v47 = vadd.f32 %v1445_v44, %v1409_v42 }
 0x2ea   : > { %v1484_v48 = vpop.f32.mrf.mxu3 }
 0x2eb   : > { %v1487_v51 = vadd.f32 %v1484_v48, %v1448_v47  ;;  %v1523_v53 = vpop.f32.mrf.mxu2 }
 0x2ed   : > { %v1526_v55 = vadd.f32 %v1523_v53, %v1487_v51 }
 0x2f1   : > { %v1562_v56 = vpop.f32.mrf.mxu0 }
 0x2f2   : > { %v1565_v59 = vadd.f32 %v1562_v56, %v1526_v55 }
 0x2f4   : > { %v1601_v60 = vpop.f32.mrf.mxu1 }
 0x2f5   : > { %v1604_v0 = vadd.f32 %v1601_v60, %v1565_v59 }
 0x2fa   : > { %v1640_v62 = vpop.f32.mrf.mxu3 }
 0x2fb   : > { %v1643_v2 = vadd.f32 %v1640_v62, %v1604_v0  ;;  %v1679_v4 = vpop.f32.mrf.mxu2 }
 0x2fd   : > { %v1682_v6 = vadd.f32 %v1679_v4, %v1643_v2 }
 0x308   : > { %v1718_v7 = vpop.f32.mrf.mxu0 }
 0x309   : > { %v1721_v8 = vadd.f32 %v1718_v7, %v1682_v6 }
 0x30b   : > { %v1757_v9 = vpop.f32.mrf.mxu1 }
 0x30c   : > { %v1760_v10 = vadd.f32 %v1757_v9, %v1721_v8 }
 0x30e   : > { %v1761_v11 = vmax.f32 %v1760_v10, 0.0 }
 0x310   : > { %1795 = vmatmul.f32.vlgmr.msra.gmra.mxu3 %v1761_v11 }
 0x393   : > { %v1796_v16 = vpop.f32.mrf.mxu3 }
 0x394   : > { %v1797_v17 = vadd.f32 %v1796_v16, %v1778_v15 }
 0x396   : > { %v1799_v18 = vmax.f32 %v1797_v17, 0.0 }
 0x398   : > { %1833 = vmatmul.f32.vlgmr.msra.gmra.mxu2 %v1799_v18 }
 0x41b   : > { %v1834_v20 = vpop.f32.mrf.mxu2 }
 0x41c   : > { %v1835_v21 = vadd.f32 %v1834_v20, %v1816_v19 }
 0x41e   : > { %1837 = vst [vmem:[%s488_s26] sm:$0x1] %v1835_v21 }
 0x41f   : > { %2388 = shalt.err (!%p2385_p9)
}
 0x420   : > { %2102 = dma.vmem_to_hbm [thread:$0]  (%p2608_p13), %s1850_s1, 16, %s1852_s15, %s1839_s22  }
 0x421 PF: > { %s1863_s16 = sand.u32 1, %s2427_s17   ;;  %p2906_p10 = scmp.ge.s32.totalorder %s2439_s20, 2 }
 0x422   : > { %s1864_s25 = scalar_lea.sflag [#allocation4], %s1863_s16 }
 0x423   : > { %p2125_p11 = pnand %p2906_p10, %p2613_p4 }
 0x425   : > { %p2126_p0 = pneg %p2125_p11 }
 0x427   : > { %2422 = dma.done.wait (%p2126_p0), %s1864_s25, 16  }
 0x428   : > { %2424 = vsyncadd (%p2126_p0), %s1864_s25, 4294967280  ;;  %p27_p2 = scmp.ge.s32.totalorder %s2588_s30, 4   ;;  %s2907_s17 = smov %s2431_s18 }
 0x429   : > { %s2908_s18 = smov %s2435_s19  ;;  %s2909_s19 = smov %s2600_s23 }
 0x42a   : > { %s2910_s20 = smov %s2588_s30  ;;  %29 = sbr.rel (!%p27_p2) target bundleno = 14 (0xe), region = 148 }
 0x42f   :  { %1869 = vsyncpa [#allocation3], 1 }
 0x430   :  { %1871 = vsyncpa [#allocation3 + $0x1], 1 }
 0x431   :  { %1872 = vsyncpa [#allocation6], 1 }
 0x432   :  { %1873 = vsyncpa [#allocation9], 1 }
 0x433   :  { %1874 = vsyncpa [#allocation12], 1 }
 0x434   :  { %1875 = vsyncpa [#allocation4], 1 }
 0x435   :  { %1877 = vsyncpa [#allocation4 + $0x1], 1 }

</bundles_post_ra>
